<compile_context>
chip_gen: v7x
topology: tpu7x:2x2x1
jax: 0.10.0
libtpu: 0.0.40
codegen_flags: <defaults>
</compile_context>

<pallas_src>
import functools

import jax
import jax.numpy as jnp
from jax.experimental import pallas as pl
from jax.experimental.pallas import tpu as pltpu

_NEG_INF = -1e30
_LEAKY_SLOPE = 0.2


def _gat_layer(h_in, adj, w, adst_blk, asrcT_blk, bias, heads, head_dim):
    """One dense GATConv layer (eval mode) on VMEM-resident f32 values."""
    n = h_in.shape[0]
    k = heads * head_dim
    xp = jnp.dot(h_in, w, preferred_element_type=jnp.float32)             # (N, H*D)
    xpT = xp.T                                                             # (H*D, N)
    a_dst = jnp.dot(xp, adst_blk, preferred_element_type=jnp.float32)     # (N, H)
    a_srcT = jnp.dot(asrcT_blk, xpT, preferred_element_type=jnp.float32)  # (H, N)

    lane = jax.lax.broadcasted_iota(jnp.int32, (1, k), 1)                  # head-id of col
    out = jnp.zeros((n, k), jnp.float32)
    for h in range(heads):  # static unroll (heads = 8 or 1)
        e = a_dst[:, h:h + 1] + a_srcT[h:h + 1, :]                         # (N,N): e[i,j]
        e = jnp.where(e > 0, e, _LEAKY_SLOPE * e)                          # LeakyReLU(0.2)
        e = jnp.where(adj > 0, e, _NEG_INF)                                # mask non-edges
        e = e - jnp.max(e, axis=-1, keepdims=True)
        p = jnp.where(adj > 0, jnp.exp(e), 0.0)
        a = p / jnp.sum(p, axis=-1, keepdims=True)                         # softmax over j
        # TODO(synk): training-mode dropout(p=0.6) on attention coeffs `a`
        # (pltpu.prng_seed + pltpu.prng_random_bits); eval mode = identity.
        head_cols = jnp.logical_and(lane >= h * head_dim,
                                    lane < (h + 1) * head_dim)             # (1, K) mask
        xp_h = jnp.where(head_cols, xp, 0.0)                               # head-h columns
        out = out + jnp.dot(a, xp_h, preferred_element_type=jnp.float32)   # (N, K)
    return out + bias


def _gat_kernel(x_ref, adj_ref, w1_ref, adst1_ref, asrc1t_ref, b1_ref,
                w2_ref, adst2_ref, asrc2t_ref, b2_ref, o_ref,
                *, heads1, head_dim1, head_dim2):
    # TODO(synk): input dropout(p=0.6) in training mode (identity in eval).
    h1 = _gat_layer(x_ref[...], adj_ref[...], w1_ref[...], adst1_ref[...],
                    asrc1t_ref[...], b1_ref[...], heads1, head_dim1)
    h1 = jnp.where(h1 > 0, h1, jnp.exp(h1) - 1.0)                          # ELU
    # TODO(synk): inter-layer dropout(p=0.6) in training mode.
    out = _gat_layer(h1, adj_ref[...], w2_ref[...], adst2_ref[...],
                     asrc2t_ref[...], b2_ref[...], heads=1,
                     head_dim=head_dim2)
    o_ref[...] = out.astype(o_ref.dtype)


def _block_diag_att(att):
    """(heads, dim) attention vector -> (heads*dim, heads) block-diagonal."""
    heads, dim = att.shape
    eye = jnp.eye(heads, dtype=att.dtype)
    return (att[:, :, None] * eye[:, None, :]).reshape(heads * dim, heads)


def _round_up(v, m):
    return (v + m - 1) // m * m


def gat_forward(x, edge_index, params, *, heads=8):
    """Eval-mode forward of the two-layer GAT as a single fused Pallas kernel."""
    n, f = x.shape
    w1, att_src1, att_dst1, b1 = (params["w1"], params["att_src1"],
                                  params["att_dst1"], params["b1"])
    w2, att_src2, att_dst2, b2 = (params["w2"], params["att_src2"],
                                  params["att_dst2"], params["b2"])
    hid = w1.shape[1] // heads
    c = w2.shape[1]
    k1 = heads * hid

    # Dense adjacency mask with self-loops: adj[i, j] = 1 iff edge j -> i.
    src, dst = edge_index[0], edge_index[1]
    adj = jnp.zeros((n, n), jnp.float32).at[dst, src].set(1.0)
    adj = jnp.maximum(adj, jnp.eye(n, dtype=jnp.float32))

    # Pad the class dim to a lane-dense multiple of 128 (exact: padded weight /
    # attention / bias columns are zero, so alphas and outputs are unchanged).
    c_pad = _round_up(max(c, 128), 128)
    w2p = jnp.zeros((w2.shape[0], c_pad), w2.dtype).at[:, :c].set(w2)
    asrc2p = jnp.zeros((1, c_pad), att_src2.dtype).at[:, :c].set(att_src2)
    adst2p = jnp.zeros((1, c_pad), att_dst2.dtype).at[:, :c].set(att_dst2)
    b2p = jnp.zeros((1, c_pad), b2.dtype).at[0, :c].set(b2)

    adst1_blk = _block_diag_att(att_dst1)            # (heads*hid, heads)
    asrc1t_blk = _block_diag_att(att_src1).T         # (heads, heads*hid)
    adst2_blk = _block_diag_att(adst2p)              # (c_pad, 1)
    asrc2t_blk = _block_diag_att(asrc2p).T           # (1, c_pad)
    b1r = b1.reshape(1, k1)

    operands = (x, adj, w1, adst1_blk, asrc1t_blk, b1r,
                w2p, adst2_blk, asrc2t_blk, b2p)
    in_specs = [pl.BlockSpec(op.shape, lambda: (0, 0)) for op in operands]

    flops = int(2 * n * f * k1 + 4 * n * k1 * heads
                + heads * (2 * n * n * k1 + 8 * n * n)
                + 2 * n * k1 * c_pad + 4 * n * c_pad
                + 2 * n * n * c_pad + 8 * n * n)
    transcendentals = int((heads + 1) * n * n + n * k1)
    bytes_accessed = int(sum(op.size * op.dtype.itemsize for op in operands)
                         + n * c_pad * 4)

    out_pad = pl.pallas_call(
        functools.partial(_gat_kernel, heads1=heads, head_dim1=hid,
                          head_dim2=c_pad),
        out_shape=jax.ShapeDtypeStruct((n, c_pad), x.dtype),
        in_specs=in_specs,
        out_specs=pl.BlockSpec((n, c_pad), lambda: (0, 0)),
        compiler_params=pltpu.CompilerParams(
            vmem_limit_bytes=32 * 1024 * 1024),   # explicit; fits v7x 64 MiB VMEM
        cost_estimate=pl.CostEstimate(flops=flops,
                                      transcendentals=transcendentals,
                                      bytes_accessed=bytes_accessed),
    )(*operands)
    return out_pad[:, :c]


def _reference(x, edge_index, params, heads):
    """Pure-JAX eval-mode reference of the same two-layer GAT."""
    n = x.shape[0]
    src, dst = edge_index[0], edge_index[1]
    adj = jnp.zeros((n, n), jnp.float32).at[dst, src].set(1.0)
    adj = jnp.maximum(adj, jnp.eye(n, dtype=jnp.float32))

    def layer(h, w, a_src, a_dst, b, nh):
        d = w.shape[1] // nh
        xp = (h @ w).reshape(n, nh, d)
        s = (xp * a_src[None, :, :]).sum(-1)              # (N, H) alpha_src
        t = (xp * a_dst[None, :, :]).sum(-1)              # (N, H) alpha_dst
        e = t[:, None, :] + s[None, :, :]                 # e[i, j, h]
        e = jnp.where(e > 0, e, _LEAKY_SLOPE * e)
        e = jnp.where(adj[:, :, None] > 0, e, _NEG_INF)
        a = jax.nn.softmax(e, axis=1)
        return jnp.einsum("ijh,jhc->ihc", a, xp).reshape(n, nh * d) + b

    h1 = jax.nn.elu(layer(x, params["w1"], params["att_src1"],
                          params["att_dst1"], params["b1"], heads))
    return layer(h1, params["w2"], params["att_src2"], params["att_dst2"],
                 params["b2"], 1)


if __name__ == "__main__":
    N, NUM_FEATURES, HIDDEN, NUM_CLASSES, HEADS = 16, 32, 16, 4, 8
    NUM_EDGES = 48

    key = jax.random.PRNGKey(0)
    ks = jax.random.split(key, 10)

    x = jax.random.normal(ks[0], (N, NUM_FEATURES), dtype=jnp.float32)
    edge_index = jnp.stack([
        jax.random.randint(ks[1], (NUM_EDGES,), 0, N, dtype=jnp.int32),  # src
        jax.random.randint(ks[2], (NUM_EDGES,), 0, N, dtype=jnp.int32),  # dst
    ])

    def glorot(k, shape):
        limit = (6.0 / (shape[0] + shape[-1])) ** 0.5
        return jax.random.uniform(k, shape, jnp.float32, -limit, limit)

    params = {
        "w1": glorot(ks[3], (NUM_FEATURES, HEADS * HIDDEN)),
        "att_src1": glorot(ks[4], (HEADS, HIDDEN)),
        "att_dst1": glorot(ks[5], (HEADS, HIDDEN)),
        "b1": 0.1 * jax.random.normal(ks[6], (HEADS * HIDDEN,), jnp.float32),
        "w2": glorot(ks[7], (HEADS * HIDDEN, NUM_CLASSES)),
        "att_src2": glorot(ks[8], (1, NUM_CLASSES)),
        "att_dst2": glorot(ks[9], (1, NUM_CLASSES)),
        "b2": 0.1 * jax.random.normal(jax.random.fold_in(key, 7),
                                      (NUM_CLASSES,), jnp.float32),
    }

    out = gat_forward(x, edge_index, params, heads=HEADS)
    jax.block_until_ready(out)

    ref = _reference(x, edge_index, params, HEADS)
    assert out.shape == (N, NUM_CLASSES)
    assert jnp.allclose(out, ref, atol=2e-3, rtol=2e-3), (
        "max abs err = %g" % float(jnp.max(jnp.abs(out - ref))))

    print("KERNEL_OK")
</pallas_src>

<mosaic_0001>
module attributes {stable_mosaic.version = 11 : i64} {
  func.func @_gat_kernel(%arg0: memref<16x32xf32, #tpu.memory_space<vmem>>, %arg1: memref<16x16xf32, #tpu.memory_space<vmem>>, %arg2: memref<32x128xf32, #tpu.memory_space<vmem>>, %arg3: memref<128x8xf32, #tpu.memory_space<vmem>>, %arg4: memref<8x128xf32, #tpu.memory_space<vmem>>, %arg5: memref<1x128xf32, #tpu.memory_space<vmem>>, %arg6: memref<128x128xf32, #tpu.memory_space<vmem>>, %arg7: memref<128x1xf32, #tpu.memory_space<vmem>>, %arg8: memref<1x128xf32, #tpu.memory_space<vmem>>, %arg9: memref<1x128xf32, #tpu.memory_space<vmem>>, %arg10: memref<16x128xf32, #tpu.memory_space<vmem>>) attributes {dimension_semantics = [], scalar_prefetch = 0 : i64, scratch_operands = 0 : i64, tpu.core_type = #tpu.core_type<tc>} {
    %c0 = arith.constant 0 : index
    %c0_0 = arith.constant 0 : index
    %0 = vector.load %arg0[%c0, %c0_0] : memref<16x32xf32, #tpu.memory_space<vmem>>, vector<16x32xf32>
    %c0_1 = arith.constant 0 : index
    %c0_2 = arith.constant 0 : index
    %1 = vector.load %arg1[%c0_1, %c0_2] : memref<16x16xf32, #tpu.memory_space<vmem>>, vector<16x16xf32>
    %c0_3 = arith.constant 0 : index
    %c0_4 = arith.constant 0 : index
    %2 = vector.load %arg2[%c0_3, %c0_4] : memref<32x128xf32, #tpu.memory_space<vmem>>, vector<32x128xf32>
    %c0_5 = arith.constant 0 : index
    %c0_6 = arith.constant 0 : index
    %3 = vector.load %arg3[%c0_5, %c0_6] : memref<128x8xf32, #tpu.memory_space<vmem>>, vector<128x8xf32>
    %c0_7 = arith.constant 0 : index
    %c0_8 = arith.constant 0 : index
    %4 = vector.load %arg4[%c0_7, %c0_8] : memref<8x128xf32, #tpu.memory_space<vmem>>, vector<8x128xf32>
    %c0_9 = arith.constant 0 : index
    %c0_10 = arith.constant 0 : index
    %5 = vector.load %arg5[%c0_9, %c0_10] : memref<1x128xf32, #tpu.memory_space<vmem>>, vector<1x128xf32>
    %cst = arith.constant dense<0.000000e+00> : vector<16x128xf32>
    %6 = tpu.matmul %0, %2, %cst {dimension_numbers = #tpu.dot_dimension_numbers<[1], [0], [0], [1], [0, 0, 1, 1], [], []>} : vector<16x32xf32>, vector<32x128xf32>, vector<16x128xf32> -> vector<16x128xf32>
    %7 = tpu.transpose %6, [1, 0] : vector<16x128xf32> -> vector<128x16xf32>
    %cst_11 = arith.constant dense<0.000000e+00> : vector<16x8xf32>
    %8 = tpu.matmul %6, %3, %cst_11 {dimension_numbers = #tpu.dot_dimension_numbers<[1], [0], [0], [1], [0, 0, 1, 1], [], []>} : vector<16x128xf32>, vector<128x8xf32>, vector<16x8xf32> -> vector<16x8xf32>
    %cst_12 = arith.constant dense<0.000000e+00> : vector<8x16xf32>
    %9 = tpu.matmul %4, %7, %cst_12 {dimension_numbers = #tpu.dot_dimension_numbers<[1], [0], [0], [1], [0, 0, 1, 1], [], []>} : vector<8x128xf32>, vector<128x16xf32>, vector<8x16xf32> -> vector<8x16xf32>
    %10 = tpu.iota {dimensions = array<i32: 1>} : vector<1x128xi32>
    %cst_13 = arith.constant 0.000000e+00 : f32
    %11 = vector.broadcast %cst_13 : f32 to vector<16x128xf32>
    %12 = vector.extract_strided_slice %8 {offsets = [0, 0], sizes = [16, 1], strides = [1, 1]} : vector<16x8xf32> to vector<16x1xf32>
    %13 = vector.extract_strided_slice %9 {offsets = [0, 0], sizes = [1, 16], strides = [1, 1]} : vector<8x16xf32> to vector<1x16xf32>
    %14 = vector.broadcast %12 : vector<16x1xf32> to vector<16x16xf32>
    %15 = vector.broadcast %13 : vector<1x16xf32> to vector<16x16xf32>
    %16 = arith.addf %14, %15 : vector<16x16xf32>
    %cst_14 = arith.constant 0.000000e+00 : f32
    %17 = vector.broadcast %cst_14 : f32 to vector<16x16xf32>
    %18 = arith.cmpf ogt, %16, %17 : vector<16x16xf32>
    %cst_15 = arith.constant 2.000000e-01 : f32
    %19 = vector.broadcast %cst_15 : f32 to vector<16x16xf32>
    %20 = arith.mulf %19, %16 : vector<16x16xf32>
    %21 = arith.select %18, %16, %20 : vector<16x16xi1>, vector<16x16xf32>
    %cst_16 = arith.constant 0.000000e+00 : f32
    %22 = vector.broadcast %cst_16 : f32 to vector<16x16xf32>
    %23 = arith.cmpf ogt, %1, %22 : vector<16x16xf32>
    %cst_17 = arith.constant -1.000000e+30 : f32
    %24 = vector.broadcast %cst_17 : f32 to vector<16x16xf32>
    %25 = arith.select %23, %21, %24 : vector<16x16xi1>, vector<16x16xf32>
    %cst_18 = arith.constant dense<0xFF800000> : vector<16xf32>
    %26 = vector.multi_reduction <maximumf>, %25, %cst_18 [1] : vector<16x16xf32> to vector<16xf32>
    %27 = vector.shape_cast %26 : vector<16xf32> to vector<16x1xf32>
    %28 = vector.broadcast %27 : vector<16x1xf32> to vector<16x16xf32>
    %29 = arith.subf %25, %28 : vector<16x16xf32>
    %cst_19 = arith.constant 0.000000e+00 : f32
    %30 = vector.broadcast %cst_19 : f32 to vector<16x16xf32>
    %31 = arith.cmpf ogt, %1, %30 : vector<16x16xf32>
    %32 = math.exp %29 : vector<16x16xf32>
    %cst_20 = arith.constant 0.000000e+00 : f32
    %33 = vector.broadcast %cst_20 : f32 to vector<16x16xf32>
    %34 = arith.select %31, %32, %33 : vector<16x16xi1>, vector<16x16xf32>
    %cst_21 = arith.constant dense<0.000000e+00> : vector<16xf32>
    %35 = vector.multi_reduction <add>, %34, %cst_21 [1] : vector<16x16xf32> to vector<16xf32>
    %36 = vector.shape_cast %35 : vector<16xf32> to vector<16x1xf32>
    %37 = vector.broadcast %36 : vector<16x1xf32> to vector<16x16xf32>
    %38 = arith.divf %34, %37 : vector<16x16xf32>
    %c0_i32 = arith.constant 0 : i32
    %39 = vector.broadcast %c0_i32 : i32 to vector<1x128xi32>
    %40 = arith.cmpi sge, %10, %39 : vector<1x128xi32>
    %c16_i32 = arith.constant 16 : i32
    %41 = vector.broadcast %c16_i32 : i32 to vector<1x128xi32>
    %42 = arith.cmpi slt, %10, %41 : vector<1x128xi32>
    %43 = arith.andi %40, %42 : vector<1x128xi1>
    %cst_22 = arith.constant 0.000000e+00 : f32
    %44 = vector.shape_cast %43 : vector<1x128xi1> to vector<1x128xi1>
    %45 = vector.broadcast %44 : vector<1x128xi1> to vector<16x128xi1>
    %46 = vector.broadcast %cst_22 : f32 to vector<16x128xf32>
    %47 = arith.select %45, %6, %46 : vector<16x128xi1>, vector<16x128xf32>
    %cst_23 = arith.constant dense<0.000000e+00> : vector<16x128xf32>
    %48 = tpu.matmul %38, %47, %cst_23 {dimension_numbers = #tpu.dot_dimension_numbers<[1], [0], [0], [1], [0, 0, 1, 1], [], []>} : vector<16x16xf32>, vector<16x128xf32>, vector<16x128xf32> -> vector<16x128xf32>
    %49 = arith.addf %11, %48 : vector<16x128xf32>
    %50 = vector.extract_strided_slice %8 {offsets = [0, 1], sizes = [16, 1], strides = [1, 1]} : vector<16x8xf32> to vector<16x1xf32>
    %51 = vector.extract_strided_slice %9 {offsets = [1, 0], sizes = [1, 16], strides = [1, 1]} : vector<8x16xf32> to vector<1x16xf32>
    %52 = vector.broadcast %50 : vector<16x1xf32> to vector<16x16xf32>
    %53 = vector.broadcast %51 : vector<1x16xf32> to vector<16x16xf32>
    %54 = arith.addf %52, %53 : vector<16x16xf32>
    %cst_24 = arith.constant 0.000000e+00 : f32
    %55 = vector.broadcast %cst_24 : f32 to vector<16x16xf32>
    %56 = arith.cmpf ogt, %54, %55 : vector<16x16xf32>
    %cst_25 = arith.constant 2.000000e-01 : f32
    %57 = vector.broadcast %cst_25 : f32 to vector<16x16xf32>
    %58 = arith.mulf %57, %54 : vector<16x16xf32>
    %59 = arith.select %56, %54, %58 : vector<16x16xi1>, vector<16x16xf32>
    %cst_26 = arith.constant 0.000000e+00 : f32
    %60 = vector.broadcast %cst_26 : f32 to vector<16x16xf32>
    %61 = arith.cmpf ogt, %1, %60 : vector<16x16xf32>
    %cst_27 = arith.constant -1.000000e+30 : f32
    %62 = vector.broadcast %cst_27 : f32 to vector<16x16xf32>
    %63 = arith.select %61, %59, %62 : vector<16x16xi1>, vector<16x16xf32>
    %cst_28 = arith.constant dense<0xFF800000> : vector<16xf32>
    %64 = vector.multi_reduction <maximumf>, %63, %cst_28 [1] : vector<16x16xf32> to vector<16xf32>
    %65 = vector.shape_cast %64 : vector<16xf32> to vector<16x1xf32>
    %66 = vector.broadcast %65 : vector<16x1xf32> to vector<16x16xf32>
    %67 = arith.subf %63, %66 : vector<16x16xf32>
    %cst_29 = arith.constant 0.000000e+00 : f32
    %68 = vector.broadcast %cst_29 : f32 to vector<16x16xf32>
    %69 = arith.cmpf ogt, %1, %68 : vector<16x16xf32>
    %70 = math.exp %67 : vector<16x16xf32>
    %cst_30 = arith.constant 0.000000e+00 : f32
    %71 = vector.broadcast %cst_30 : f32 to vector<16x16xf32>
    %72 = arith.select %69, %70, %71 : vector<16x16xi1>, vector<16x16xf32>
    %cst_31 = arith.constant dense<0.000000e+00> : vector<16xf32>
    %73 = vector.multi_reduction <add>, %72, %cst_31 [1] : vector<16x16xf32> to vector<16xf32>
    %74 = vector.shape_cast %73 : vector<16xf32> to vector<16x1xf32>
    %75 = vector.broadcast %74 : vector<16x1xf32> to vector<16x16xf32>
    %76 = arith.divf %72, %75 : vector<16x16xf32>
    %c16_i32_32 = arith.constant 16 : i32
    %77 = vector.broadcast %c16_i32_32 : i32 to vector<1x128xi32>
    %78 = arith.cmpi sge, %10, %77 : vector<1x128xi32>
    %c32_i32 = arith.constant 32 : i32
    %79 = vector.broadcast %c32_i32 : i32 to vector<1x128xi32>
    %80 = arith.cmpi slt, %10, %79 : vector<1x128xi32>
    %81 = arith.andi %78, %80 : vector<1x128xi1>
    %cst_33 = arith.constant 0.000000e+00 : f32
    %82 = vector.shape_cast %81 : vector<1x128xi1> to vector<1x128xi1>
    %83 = vector.broadcast %82 : vector<1x128xi1> to vector<16x128xi1>
    %84 = vector.broadcast %cst_33 : f32 to vector<16x128xf32>
    %85 = arith.select %83, %6, %84 : vector<16x128xi1>, vector<16x128xf32>
    %cst_34 = arith.constant dense<0.000000e+00> : vector<16x128xf32>
    %86 = tpu.matmul %76, %85, %cst_34 {dimension_numbers = #tpu.dot_dimension_numbers<[1], [0], [0], [1], [0, 0, 1, 1], [], []>} : vector<16x16xf32>, vector<16x128xf32>, vector<16x128xf32> -> vector<16x128xf32>
    %87 = arith.addf %49, %86 : vector<16x128xf32>
    %88 = vector.extract_strided_slice %8 {offsets = [0, 2], sizes = [16, 1], strides = [1, 1]} : vector<16x8xf32> to vector<16x1xf32>
    %89 = vector.extract_strided_slice %9 {offsets = [2, 0], sizes = [1, 16], strides = [1, 1]} : vector<8x16xf32> to vector<1x16xf32>
    %90 = vector.broadcast %88 : vector<16x1xf32> to vector<16x16xf32>
    %91 = vector.broadcast %89 : vector<1x16xf32> to vector<16x16xf32>
    %92 = arith.addf %90, %91 : vector<16x16xf32>
    %cst_35 = arith.constant 0.000000e+00 : f32
    %93 = vector.broadcast %cst_35 : f32 to vector<16x16xf32>
    %94 = arith.cmpf ogt, %92, %93 : vector<16x16xf32>
    %cst_36 = arith.constant 2.000000e-01 : f32
    %95 = vector.broadcast %cst_36 : f32 to vector<16x16xf32>
    %96 = arith.mulf %95, %92 : vector<16x16xf32>
    %97 = arith.select %94, %92, %96 : vector<16x16xi1>, vector<16x16xf32>
    %cst_37 = arith.constant 0.000000e+00 : f32
    %98 = vector.broadcast %cst_37 : f32 to vector<16x16xf32>
    %99 = arith.cmpf ogt, %1, %98 : vector<16x16xf32>
    %cst_38 = arith.constant -1.000000e+30 : f32
    %100 = vector.broadcast %cst_38 : f32 to vector<16x16xf32>
    %101 = arith.select %99, %97, %100 : vector<16x16xi1>, vector<16x16xf32>
    %cst_39 = arith.constant dense<0xFF800000> : vector<16xf32>
    %102 = vector.multi_reduction <maximumf>, %101, %cst_39 [1] : vector<16x16xf32> to vector<16xf32>
    %103 = vector.shape_cast %102 : vector<16xf32> to vector<16x1xf32>
    %104 = vector.broadcast %103 : vector<16x1xf32> to vector<16x16xf32>
    %105 = arith.subf %101, %104 : vector<16x16xf32>
    %cst_40 = arith.constant 0.000000e+00 : f32
    %106 = vector.broadcast %cst_40 : f32 to vector<16x16xf32>
    %107 = arith.cmpf ogt, %1, %106 : vector<16x16xf32>
    %108 = math.exp %105 : vector<16x16xf32>
    %cst_41 = arith.constant 0.000000e+00 : f32
    %109 = vector.broadcast %cst_41 : f32 to vector<16x16xf32>
    %110 = arith.select %107, %108, %109 : vector<16x16xi1>, vector<16x16xf32>
    %cst_42 = arith.constant dense<0.000000e+00> : vector<16xf32>
    %111 = vector.multi_reduction <add>, %110, %cst_42 [1] : vector<16x16xf32> to vector<16xf32>
    %112 = vector.shape_cast %111 : vector<16xf32> to vector<16x1xf32>
    %113 = vector.broadcast %112 : vector<16x1xf32> to vector<16x16xf32>
    %114 = arith.divf %110, %113 : vector<16x16xf32>
    %c32_i32_43 = arith.constant 32 : i32
    %115 = vector.broadcast %c32_i32_43 : i32 to vector<1x128xi32>
    %116 = arith.cmpi sge, %10, %115 : vector<1x128xi32>
    %c48_i32 = arith.constant 48 : i32
    %117 = vector.broadcast %c48_i32 : i32 to vector<1x128xi32>
    %118 = arith.cmpi slt, %10, %117 : vector<1x128xi32>
    %119 = arith.andi %116, %118 : vector<1x128xi1>
    %cst_44 = arith.constant 0.000000e+00 : f32
    %120 = vector.shape_cast %119 : vector<1x128xi1> to vector<1x128xi1>
    %121 = vector.broadcast %120 : vector<1x128xi1> to vector<16x128xi1>
    %122 = vector.broadcast %cst_44 : f32 to vector<16x128xf32>
    %123 = arith.select %121, %6, %122 : vector<16x128xi1>, vector<16x128xf32>
    %cst_45 = arith.constant dense<0.000000e+00> : vector<16x128xf32>
    %124 = tpu.matmul %114, %123, %cst_45 {dimension_numbers = #tpu.dot_dimension_numbers<[1], [0], [0], [1], [0, 0, 1, 1], [], []>} : vector<16x16xf32>, vector<16x128xf32>, vector<16x128xf32> -> vector<16x128xf32>
    %125 = arith.addf %87, %124 : vector<16x128xf32>
    %126 = vector.extract_strided_slice %8 {offsets = [0, 3], sizes = [16, 1], strides = [1, 1]} : vector<16x8xf32> to vector<16x1xf32>
    %127 = vector.extract_strided_slice %9 {offsets = [3, 0], sizes = [1, 16], strides = [1, 1]} : vector<8x16xf32> to vector<1x16xf32>
    %128 = vector.broadcast %126 : vector<16x1xf32> to vector<16x16xf32>
    %129 = vector.broadcast %127 : vector<1x16xf32> to vector<16x16xf32>
    %130 = arith.addf %128, %129 : vector<16x16xf32>
    %cst_46 = arith.constant 0.000000e+00 : f32
    %131 = vector.broadcast %cst_46 : f32 to vector<16x16xf32>
    %132 = arith.cmpf ogt, %130, %131 : vector<16x16xf32>
    %cst_47 = arith.constant 2.000000e-01 : f32
    %133 = vector.broadcast %cst_47 : f32 to vector<16x16xf32>
    %134 = arith.mulf %133, %130 : vector<16x16xf32>
    %135 = arith.select %132, %130, %134 : vector<16x16xi1>, vector<16x16xf32>
    %cst_48 = arith.constant 0.000000e+00 : f32
    %136 = vector.broadcast %cst_48 : f32 to vector<16x16xf32>
    %137 = arith.cmpf ogt, %1, %136 : vector<16x16xf32>
    %cst_49 = arith.constant -1.000000e+30 : f32
    %138 = vector.broadcast %cst_49 : f32 to vector<16x16xf32>
    %139 = arith.select %137, %135, %138 : vector<16x16xi1>, vector<16x16xf32>
    %cst_50 = arith.constant dense<0xFF800000> : vector<16xf32>
    %140 = vector.multi_reduction <maximumf>, %139, %cst_50 [1] : vector<16x16xf32> to vector<16xf32>
    %141 = vector.shape_cast %140 : vector<16xf32> to vector<16x1xf32>
    %142 = vector.broadcast %141 : vector<16x1xf32> to vector<16x16xf32>
    %143 = arith.subf %139, %142 : vector<16x16xf32>
    %cst_51 = arith.constant 0.000000e+00 : f32
    %144 = vector.broadcast %cst_51 : f32 to vector<16x16xf32>
    %145 = arith.cmpf ogt, %1, %144 : vector<16x16xf32>
    %146 = math.exp %143 : vector<16x16xf32>
    %cst_52 = arith.constant 0.000000e+00 : f32
    %147 = vector.broadcast %cst_52 : f32 to vector<16x16xf32>
    %148 = arith.select %145, %146, %147 : vector<16x16xi1>, vector<16x16xf32>
    %cst_53 = arith.constant dense<0.000000e+00> : vector<16xf32>
    %149 = vector.multi_reduction <add>, %148, %cst_53 [1] : vector<16x16xf32> to vector<16xf32>
    %150 = vector.shape_cast %149 : vector<16xf32> to vector<16x1xf32>
    %151 = vector.broadcast %150 : vector<16x1xf32> to vector<16x16xf32>
    %152 = arith.divf %148, %151 : vector<16x16xf32>
    %c48_i32_54 = arith.constant 48 : i32
    %153 = vector.broadcast %c48_i32_54 : i32 to vector<1x128xi32>
    %154 = arith.cmpi sge, %10, %153 : vector<1x128xi32>
    %c64_i32 = arith.constant 64 : i32
    %155 = vector.broadcast %c64_i32 : i32 to vector<1x128xi32>
    %156 = arith.cmpi slt, %10, %155 : vector<1x128xi32>
    %157 = arith.andi %154, %156 : vector<1x128xi1>
    %cst_55 = arith.constant 0.000000e+00 : f32
    %158 = vector.shape_cast %157 : vector<1x128xi1> to vector<1x128xi1>
    %159 = vector.broadcast %158 : vector<1x128xi1> to vector<16x128xi1>
    %160 = vector.broadcast %cst_55 : f32 to vector<16x128xf32>
    %161 = arith.select %159, %6, %160 : vector<16x128xi1>, vector<16x128xf32>
    %cst_56 = arith.constant dense<0.000000e+00> : vector<16x128xf32>
    %162 = tpu.matmul %152, %161, %cst_56 {dimension_numbers = #tpu.dot_dimension_numbers<[1], [0], [0], [1], [0, 0, 1, 1], [], []>} : vector<16x16xf32>, vector<16x128xf32>, vector<16x128xf32> -> vector<16x128xf32>
    %163 = arith.addf %125, %162 : vector<16x128xf32>
    %164 = vector.extract_strided_slice %8 {offsets = [0, 4], sizes = [16, 1], strides = [1, 1]} : vector<16x8xf32> to vector<16x1xf32>
    %165 = vector.extract_strided_slice %9 {offsets = [4, 0], sizes = [1, 16], strides = [1, 1]} : vector<8x16xf32> to vector<1x16xf32>
    %166 = vector.broadcast %164 : vector<16x1xf32> to vector<16x16xf32>
    %167 = vector.broadcast %165 : vector<1x16xf32> to vector<16x16xf32>
    %168 = arith.addf %166, %167 : vector<16x16xf32>
    %cst_57 = arith.constant 0.000000e+00 : f32
    %169 = vector.broadcast %cst_57 : f32 to vector<16x16xf32>
    %170 = arith.cmpf ogt, %168, %169 : vector<16x16xf32>
    %cst_58 = arith.constant 2.000000e-01 : f32
    %171 = vector.broadcast %cst_58 : f32 to vector<16x16xf32>
    %172 = arith.mulf %171, %168 : vector<16x16xf32>
    %173 = arith.select %170, %168, %172 : vector<16x16xi1>, vector<16x16xf32>
    %cst_59 = arith.constant 0.000000e+00 : f32
    %174 = vector.broadcast %cst_59 : f32 to vector<16x16xf32>
    %175 = arith.cmpf ogt, %1, %174 : vector<16x16xf32>
    %cst_60 = arith.constant -1.000000e+30 : f32
    %176 = vector.broadcast %cst_60 : f32 to vector<16x16xf32>
    %177 = arith.select %175, %173, %176 : vector<16x16xi1>, vector<16x16xf32>
    %cst_61 = arith.constant dense<0xFF800000> : vector<16xf32>
    %178 = vector.multi_reduction <maximumf>, %177, %cst_61 [1] : vector<16x16xf32> to vector<16xf32>
    %179 = vector.shape_cast %178 : vector<16xf32> to vector<16x1xf32>
    %180 = vector.broadcast %179 : vector<16x1xf32> to vector<16x16xf32>
    %181 = arith.subf %177, %180 : vector<16x16xf32>
    %cst_62 = arith.constant 0.000000e+00 : f32
    %182 = vector.broadcast %cst_62 : f32 to vector<16x16xf32>
    %183 = arith.cmpf ogt, %1, %182 : vector<16x16xf32>
    %184 = math.exp %181 : vector<16x16xf32>
    %cst_63 = arith.constant 0.000000e+00 : f32
    %185 = vector.broadcast %cst_63 : f32 to vector<16x16xf32>
    %186 = arith.select %183, %184, %185 : vector<16x16xi1>, vector<16x16xf32>
    %cst_64 = arith.constant dense<0.000000e+00> : vector<16xf32>
    %187 = vector.multi_reduction <add>, %186, %cst_64 [1] : vector<16x16xf32> to vector<16xf32>
    %188 = vector.shape_cast %187 : vector<16xf32> to vector<16x1xf32>
    %189 = vector.broadcast %188 : vector<16x1xf32> to vector<16x16xf32>
    %190 = arith.divf %186, %189 : vector<16x16xf32>
    %c64_i32_65 = arith.constant 64 : i32
    %191 = vector.broadcast %c64_i32_65 : i32 to vector<1x128xi32>
    %192 = arith.cmpi sge, %10, %191 : vector<1x128xi32>
    %c80_i32 = arith.constant 80 : i32
    %193 = vector.broadcast %c80_i32 : i32 to vector<1x128xi32>
    %194 = arith.cmpi slt, %10, %193 : vector<1x128xi32>
    %195 = arith.andi %192, %194 : vector<1x128xi1>
    %cst_66 = arith.constant 0.000000e+00 : f32
    %196 = vector.shape_cast %195 : vector<1x128xi1> to vector<1x128xi1>
    %197 = vector.broadcast %196 : vector<1x128xi1> to vector<16x128xi1>
    %198 = vector.broadcast %cst_66 : f32 to vector<16x128xf32>
    %199 = arith.select %197, %6, %198 : vector<16x128xi1>, vector<16x128xf32>
    %cst_67 = arith.constant dense<0.000000e+00> : vector<16x128xf32>
    %200 = tpu.matmul %190, %199, %cst_67 {dimension_numbers = #tpu.dot_dimension_numbers<[1], [0], [0], [1], [0, 0, 1, 1], [], []>} : vector<16x16xf32>, vector<16x128xf32>, vector<16x128xf32> -> vector<16x128xf32>
    %201 = arith.addf %163, %200 : vector<16x128xf32>
    %202 = vector.extract_strided_slice %8 {offsets = [0, 5], sizes = [16, 1], strides = [1, 1]} : vector<16x8xf32> to vector<16x1xf32>
    %203 = vector.extract_strided_slice %9 {offsets = [5, 0], sizes = [1, 16], strides = [1, 1]} : vector<8x16xf32> to vector<1x16xf32>
    %204 = vector.broadcast %202 : vector<16x1xf32> to vector<16x16xf32>
    %205 = vector.broadcast %203 : vector<1x16xf32> to vector<16x16xf32>
    %206 = arith.addf %204, %205 : vector<16x16xf32>
    %cst_68 = arith.constant 0.000000e+00 : f32
    %207 = vector.broadcast %cst_68 : f32 to vector<16x16xf32>
    %208 = arith.cmpf ogt, %206, %207 : vector<16x16xf32>
    %cst_69 = arith.constant 2.000000e-01 : f32
    %209 = vector.broadcast %cst_69 : f32 to vector<16x16xf32>
    %210 = arith.mulf %209, %206 : vector<16x16xf32>
    %211 = arith.select %208, %206, %210 : vector<16x16xi1>, vector<16x16xf32>
    %cst_70 = arith.constant 0.000000e+00 : f32
    %212 = vector.broadcast %cst_70 : f32 to vector<16x16xf32>
    %213 = arith.cmpf ogt, %1, %212 : vector<16x16xf32>
    %cst_71 = arith.constant -1.000000e+30 : f32
    %214 = vector.broadcast %cst_71 : f32 to vector<16x16xf32>
    %215 = arith.select %213, %211, %214 : vector<16x16xi1>, vector<16x16xf32>
    %cst_72 = arith.constant dense<0xFF800000> : vector<16xf32>
    %216 = vector.multi_reduction <maximumf>, %215, %cst_72 [1] : vector<16x16xf32> to vector<16xf32>
    %217 = vector.shape_cast %216 : vector<16xf32> to vector<16x1xf32>
    %218 = vector.broadcast %217 : vector<16x1xf32> to vector<16x16xf32>
    %219 = arith.subf %215, %218 : vector<16x16xf32>
    %cst_73 = arith.constant 0.000000e+00 : f32
    %220 = vector.broadcast %cst_73 : f32 to vector<16x16xf32>
    %221 = arith.cmpf ogt, %1, %220 : vector<16x16xf32>
    %222 = math.exp %219 : vector<16x16xf32>
    %cst_74 = arith.constant 0.000000e+00 : f32
    %223 = vector.broadcast %cst_74 : f32 to vector<16x16xf32>
    %224 = arith.select %221, %222, %223 : vector<16x16xi1>, vector<16x16xf32>
    %cst_75 = arith.constant dense<0.000000e+00> : vector<16xf32>
    %225 = vector.multi_reduction <add>, %224, %cst_75 [1] : vector<16x16xf32> to vector<16xf32>
    %226 = vector.shape_cast %225 : vector<16xf32> to vector<16x1xf32>
    %227 = vector.broadcast %226 : vector<16x1xf32> to vector<16x16xf32>
    %228 = arith.divf %224, %227 : vector<16x16xf32>
    %c80_i32_76 = arith.constant 80 : i32
    %229 = vector.broadcast %c80_i32_76 : i32 to vector<1x128xi32>
    %230 = arith.cmpi sge, %10, %229 : vector<1x128xi32>
    %c96_i32 = arith.constant 96 : i32
    %231 = vector.broadcast %c96_i32 : i32 to vector<1x128xi32>
    %232 = arith.cmpi slt, %10, %231 : vector<1x128xi32>
    %233 = arith.andi %230, %232 : vector<1x128xi1>
    %cst_77 = arith.constant 0.000000e+00 : f32
    %234 = vector.shape_cast %233 : vector<1x128xi1> to vector<1x128xi1>
    %235 = vector.broadcast %234 : vector<1x128xi1> to vector<16x128xi1>
    %236 = vector.broadcast %cst_77 : f32 to vector<16x128xf32>
    %237 = arith.select %235, %6, %236 : vector<16x128xi1>, vector<16x128xf32>
    %cst_78 = arith.constant dense<0.000000e+00> : vector<16x128xf32>
    %238 = tpu.matmul %228, %237, %cst_78 {dimension_numbers = #tpu.dot_dimension_numbers<[1], [0], [0], [1], [0, 0, 1, 1], [], []>} : vector<16x16xf32>, vector<16x128xf32>, vector<16x128xf32> -> vector<16x128xf32>
    %239 = arith.addf %201, %238 : vector<16x128xf32>
    %240 = vector.extract_strided_slice %8 {offsets = [0, 6], sizes = [16, 1], strides = [1, 1]} : vector<16x8xf32> to vector<16x1xf32>
    %241 = vector.extract_strided_slice %9 {offsets = [6, 0], sizes = [1, 16], strides = [1, 1]} : vector<8x16xf32> to vector<1x16xf32>
    %242 = vector.broadcast %240 : vector<16x1xf32> to vector<16x16xf32>
    %243 = vector.broadcast %241 : vector<1x16xf32> to vector<16x16xf32>
    %244 = arith.addf %242, %243 : vector<16x16xf32>
    %cst_79 = arith.constant 0.000000e+00 : f32
    %245 = vector.broadcast %cst_79 : f32 to vector<16x16xf32>
    %246 = arith.cmpf ogt, %244, %245 : vector<16x16xf32>
    %cst_80 = arith.constant 2.000000e-01 : f32
    %247 = vector.broadcast %cst_80 : f32 to vector<16x16xf32>
    %248 = arith.mulf %247, %244 : vector<16x16xf32>
    %249 = arith.select %246, %244, %248 : vector<16x16xi1>, vector<16x16xf32>
    %cst_81 = arith.constant 0.000000e+00 : f32
    %250 = vector.broadcast %cst_81 : f32 to vector<16x16xf32>
    %251 = arith.cmpf ogt, %1, %250 : vector<16x16xf32>
    %cst_82 = arith.constant -1.000000e+30 : f32
    %252 = vector.broadcast %cst_82 : f32 to vector<16x16xf32>
    %253 = arith.select %251, %249, %252 : vector<16x16xi1>, vector<16x16xf32>
    %cst_83 = arith.constant dense<0xFF800000> : vector<16xf32>
    %254 = vector.multi_reduction <maximumf>, %253, %cst_83 [1] : vector<16x16xf32> to vector<16xf32>
    %255 = vector.shape_cast %254 : vector<16xf32> to vector<16x1xf32>
    %256 = vector.broadcast %255 : vector<16x1xf32> to vector<16x16xf32>
    %257 = arith.subf %253, %256 : vector<16x16xf32>
    %cst_84 = arith.constant 0.000000e+00 : f32
    %258 = vector.broadcast %cst_84 : f32 to vector<16x16xf32>
    %259 = arith.cmpf ogt, %1, %258 : vector<16x16xf32>
    %260 = math.exp %257 : vector<16x16xf32>
    %cst_85 = arith.constant 0.000000e+00 : f32
    %261 = vector.broadcast %cst_85 : f32 to vector<16x16xf32>
    %262 = arith.select %259, %260, %261 : vector<16x16xi1>, vector<16x16xf32>
    %cst_86 = arith.constant dense<0.000000e+00> : vector<16xf32>
    %263 = vector.multi_reduction <add>, %262, %cst_86 [1] : vector<16x16xf32> to vector<16xf32>
    %264 = vector.shape_cast %263 : vector<16xf32> to vector<16x1xf32>
    %265 = vector.broadcast %264 : vector<16x1xf32> to vector<16x16xf32>
    %266 = arith.divf %262, %265 : vector<16x16xf32>
    %c96_i32_87 = arith.constant 96 : i32
    %267 = vector.broadcast %c96_i32_87 : i32 to vector<1x128xi32>
    %268 = arith.cmpi sge, %10, %267 : vector<1x128xi32>
    %c112_i32 = arith.constant 112 : i32
    %269 = vector.broadcast %c112_i32 : i32 to vector<1x128xi32>
    %270 = arith.cmpi slt, %10, %269 : vector<1x128xi32>
    %271 = arith.andi %268, %270 : vector<1x128xi1>
    %cst_88 = arith.constant 0.000000e+00 : f32
    %272 = vector.shape_cast %271 : vector<1x128xi1> to vector<1x128xi1>
    %273 = vector.broadcast %272 : vector<1x128xi1> to vector<16x128xi1>
    %274 = vector.broadcast %cst_88 : f32 to vector<16x128xf32>
    %275 = arith.select %273, %6, %274 : vector<16x128xi1>, vector<16x128xf32>
    %cst_89 = arith.constant dense<0.000000e+00> : vector<16x128xf32>
    %276 = tpu.matmul %266, %275, %cst_89 {dimension_numbers = #tpu.dot_dimension_numbers<[1], [0], [0], [1], [0, 0, 1, 1], [], []>} : vector<16x16xf32>, vector<16x128xf32>, vector<16x128xf32> -> vector<16x128xf32>
    %277 = arith.addf %239, %276 : vector<16x128xf32>
    %278 = vector.extract_strided_slice %8 {offsets = [0, 7], sizes = [16, 1], strides = [1, 1]} : vector<16x8xf32> to vector<16x1xf32>
    %279 = vector.extract_strided_slice %9 {offsets = [7, 0], sizes = [1, 16], strides = [1, 1]} : vector<8x16xf32> to vector<1x16xf32>
    %280 = vector.broadcast %278 : vector<16x1xf32> to vector<16x16xf32>
    %281 = vector.broadcast %279 : vector<1x16xf32> to vector<16x16xf32>
    %282 = arith.addf %280, %281 : vector<16x16xf32>
    %cst_90 = arith.constant 0.000000e+00 : f32
    %283 = vector.broadcast %cst_90 : f32 to vector<16x16xf32>
    %284 = arith.cmpf ogt, %282, %283 : vector<16x16xf32>
    %cst_91 = arith.constant 2.000000e-01 : f32
    %285 = vector.broadcast %cst_91 : f32 to vector<16x16xf32>
    %286 = arith.mulf %285, %282 : vector<16x16xf32>
    %287 = arith.select %284, %282, %286 : vector<16x16xi1>, vector<16x16xf32>
    %cst_92 = arith.constant 0.000000e+00 : f32
    %288 = vector.broadcast %cst_92 : f32 to vector<16x16xf32>
    %289 = arith.cmpf ogt, %1, %288 : vector<16x16xf32>
    %cst_93 = arith.constant -1.000000e+30 : f32
    %290 = vector.broadcast %cst_93 : f32 to vector<16x16xf32>
    %291 = arith.select %289, %287, %290 : vector<16x16xi1>, vector<16x16xf32>
    %cst_94 = arith.constant dense<0xFF800000> : vector<16xf32>
    %292 = vector.multi_reduction <maximumf>, %291, %cst_94 [1] : vector<16x16xf32> to vector<16xf32>
    %293 = vector.shape_cast %292 : vector<16xf32> to vector<16x1xf32>
    %294 = vector.broadcast %293 : vector<16x1xf32> to vector<16x16xf32>
    %295 = arith.subf %291, %294 : vector<16x16xf32>
    %cst_95 = arith.constant 0.000000e+00 : f32
    %296 = vector.broadcast %cst_95 : f32 to vector<16x16xf32>
    %297 = arith.cmpf ogt, %1, %296 : vector<16x16xf32>
    %298 = math.exp %295 : vector<16x16xf32>
    %cst_96 = arith.constant 0.000000e+00 : f32
    %299 = vector.broadcast %cst_96 : f32 to vector<16x16xf32>
    %300 = arith.select %297, %298, %299 : vector<16x16xi1>, vector<16x16xf32>
    %cst_97 = arith.constant dense<0.000000e+00> : vector<16xf32>
    %301 = vector.multi_reduction <add>, %300, %cst_97 [1] : vector<16x16xf32> to vector<16xf32>
    %302 = vector.shape_cast %301 : vector<16xf32> to vector<16x1xf32>
    %303 = vector.broadcast %302 : vector<16x1xf32> to vector<16x16xf32>
    %304 = arith.divf %300, %303 : vector<16x16xf32>
    %c112_i32_98 = arith.constant 112 : i32
    %305 = vector.broadcast %c112_i32_98 : i32 to vector<1x128xi32>
    %306 = arith.cmpi sge, %10, %305 : vector<1x128xi32>
    %c128_i32 = arith.constant 128 : i32
    %307 = vector.broadcast %c128_i32 : i32 to vector<1x128xi32>
    %308 = arith.cmpi slt, %10, %307 : vector<1x128xi32>
    %309 = arith.andi %306, %308 : vector<1x128xi1>
    %cst_99 = arith.constant 0.000000e+00 : f32
    %310 = vector.shape_cast %309 : vector<1x128xi1> to vector<1x128xi1>
    %311 = vector.broadcast %310 : vector<1x128xi1> to vector<16x128xi1>
    %312 = vector.broadcast %cst_99 : f32 to vector<16x128xf32>
    %313 = arith.select %311, %6, %312 : vector<16x128xi1>, vector<16x128xf32>
    %cst_100 = arith.constant dense<0.000000e+00> : vector<16x128xf32>
    %314 = tpu.matmul %304, %313, %cst_100 {dimension_numbers = #tpu.dot_dimension_numbers<[1], [0], [0], [1], [0, 0, 1, 1], [], []>} : vector<16x16xf32>, vector<16x128xf32>, vector<16x128xf32> -> vector<16x128xf32>
    %315 = arith.addf %277, %314 : vector<16x128xf32>
    %316 = vector.broadcast %5 : vector<1x128xf32> to vector<16x128xf32>
    %317 = arith.addf %315, %316 : vector<16x128xf32>
    %cst_101 = arith.constant 0.000000e+00 : f32
    %318 = vector.broadcast %cst_101 : f32 to vector<16x128xf32>
    %319 = arith.cmpf ogt, %317, %318 : vector<16x128xf32>
    %320 = math.exp %317 : vector<16x128xf32>
    %cst_102 = arith.constant 1.000000e+00 : f32
    %321 = vector.broadcast %cst_102 : f32 to vector<16x128xf32>
    %322 = arith.subf %320, %321 : vector<16x128xf32>
    %323 = arith.select %319, %317, %322 : vector<16x128xi1>, vector<16x128xf32>
    %c0_103 = arith.constant 0 : index
    %c0_104 = arith.constant 0 : index
    %324 = vector.load %arg1[%c0_103, %c0_104] : memref<16x16xf32, #tpu.memory_space<vmem>>, vector<16x16xf32>
    %c0_105 = arith.constant 0 : index
    %c0_106 = arith.constant 0 : index
    %325 = vector.load %arg6[%c0_105, %c0_106] : memref<128x128xf32, #tpu.memory_space<vmem>>, vector<128x128xf32>
    %c0_107 = arith.constant 0 : index
    %c0_108 = arith.constant 0 : index
    %326 = vector.load %arg7[%c0_107, %c0_108] : memref<128x1xf32, #tpu.memory_space<vmem>>, vector<128x1xf32>
    %c0_109 = arith.constant 0 : index
    %c0_110 = arith.constant 0 : index
    %327 = vector.load %arg8[%c0_109, %c0_110] : memref<1x128xf32, #tpu.memory_space<vmem>>, vector<1x128xf32>
    %c0_111 = arith.constant 0 : index
    %c0_112 = arith.constant 0 : index
    %328 = vector.load %arg9[%c0_111, %c0_112] : memref<1x128xf32, #tpu.memory_space<vmem>>, vector<1x128xf32>
    %cst_113 = arith.constant dense<0.000000e+00> : vector<16x128xf32>
    %329 = tpu.matmul %323, %325, %cst_113 {dimension_numbers = #tpu.dot_dimension_numbers<[1], [0], [0], [1], [0, 0, 1, 1], [], []>} : vector<16x128xf32>, vector<128x128xf32>, vector<16x128xf32> -> vector<16x128xf32>
    %330 = tpu.transpose %329, [1, 0] : vector<16x128xf32> -> vector<128x16xf32>
    %cst_114 = arith.constant dense<0.000000e+00> : vector<16x1xf32>
    %331 = tpu.matmul %329, %326, %cst_114 {dimension_numbers = #tpu.dot_dimension_numbers<[1], [0], [0], [1], [0, 0, 1, 1], [], []>} : vector<16x128xf32>, vector<128x1xf32>, vector<16x1xf32> -> vector<16x1xf32>
    %cst_115 = arith.constant dense<0.000000e+00> : vector<1x16xf32>
    %332 = tpu.matmul %327, %330, %cst_115 {dimension_numbers = #tpu.dot_dimension_numbers<[1], [0], [0], [1], [0, 0, 1, 1], [], []>} : vector<1x128xf32>, vector<128x16xf32>, vector<1x16xf32> -> vector<1x16xf32>
    %333 = tpu.iota {dimensions = array<i32: 1>} : vector<1x128xi32>
    %cst_116 = arith.constant 0.000000e+00 : f32
    %334 = vector.broadcast %cst_116 : f32 to vector<16x128xf32>
    %335 = vector.broadcast %331 : vector<16x1xf32> to vector<16x16xf32>
    %336 = vector.broadcast %332 : vector<1x16xf32> to vector<16x16xf32>
    %337 = arith.addf %335, %336 : vector<16x16xf32>
    %cst_117 = arith.constant 0.000000e+00 : f32
    %338 = vector.broadcast %cst_117 : f32 to vector<16x16xf32>
    %339 = arith.cmpf ogt, %337, %338 : vector<16x16xf32>
    %cst_118 = arith.constant 2.000000e-01 : f32
    %340 = vector.broadcast %cst_118 : f32 to vector<16x16xf32>
    %341 = arith.mulf %340, %337 : vector<16x16xf32>
    %342 = arith.select %339, %337, %341 : vector<16x16xi1>, vector<16x16xf32>
    %cst_119 = arith.constant 0.000000e+00 : f32
    %343 = vector.broadcast %cst_119 : f32 to vector<16x16xf32>
    %344 = arith.cmpf ogt, %324, %343 : vector<16x16xf32>
    %cst_120 = arith.constant -1.000000e+30 : f32
    %345 = vector.broadcast %cst_120 : f32 to vector<16x16xf32>
    %346 = arith.select %344, %342, %345 : vector<16x16xi1>, vector<16x16xf32>
    %cst_121 = arith.constant dense<0xFF800000> : vector<16xf32>
    %347 = vector.multi_reduction <maximumf>, %346, %cst_121 [1] : vector<16x16xf32> to vector<16xf32>
    %348 = vector.shape_cast %347 : vector<16xf32> to vector<16x1xf32>
    %349 = vector.broadcast %348 : vector<16x1xf32> to vector<16x16xf32>
    %350 = arith.subf %346, %349 : vector<16x16xf32>
    %cst_122 = arith.constant 0.000000e+00 : f32
    %351 = vector.broadcast %cst_122 : f32 to vector<16x16xf32>
    %352 = arith.cmpf ogt, %324, %351 : vector<16x16xf32>
    %353 = math.exp %350 : vector<16x16xf32>
    %cst_123 = arith.constant 0.000000e+00 : f32
    %354 = vector.broadcast %cst_123 : f32 to vector<16x16xf32>
    %355 = arith.select %352, %353, %354 : vector<16x16xi1>, vector<16x16xf32>
    %cst_124 = arith.constant dense<0.000000e+00> : vector<16xf32>
    %356 = vector.multi_reduction <add>, %355, %cst_124 [1] : vector<16x16xf32> to vector<16xf32>
    %357 = vector.shape_cast %356 : vector<16xf32> to vector<16x1xf32>
    %358 = vector.broadcast %357 : vector<16x1xf32> to vector<16x16xf32>
    %359 = arith.divf %355, %358 : vector<16x16xf32>
    %c0_i32_125 = arith.constant 0 : i32
    %360 = vector.broadcast %c0_i32_125 : i32 to vector<1x128xi32>
    %361 = arith.cmpi sge, %333, %360 : vector<1x128xi32>
    %c128_i32_126 = arith.constant 128 : i32
    %362 = vector.broadcast %c128_i32_126 : i32 to vector<1x128xi32>
    %363 = arith.cmpi slt, %333, %362 : vector<1x128xi32>
    %364 = arith.andi %361, %363 : vector<1x128xi1>
    %cst_127 = arith.constant 0.000000e+00 : f32
    %365 = vector.shape_cast %364 : vector<1x128xi1> to vector<1x128xi1>
    %366 = vector.broadcast %365 : vector<1x128xi1> to vector<16x128xi1>
    %367 = vector.broadcast %cst_127 : f32 to vector<16x128xf32>
    %368 = arith.select %366, %329, %367 : vector<16x128xi1>, vector<16x128xf32>
    %cst_128 = arith.constant dense<0.000000e+00> : vector<16x128xf32>
    %369 = tpu.matmul %359, %368, %cst_128 {dimension_numbers = #tpu.dot_dimension_numbers<[1], [0], [0], [1], [0, 0, 1, 1], [], []>} : vector<16x16xf32>, vector<16x128xf32>, vector<16x128xf32> -> vector<16x128xf32>
    %370 = arith.addf %334, %369 : vector<16x128xf32>
    %371 = vector.broadcast %328 : vector<1x128xf32> to vector<16x128xf32>
    %372 = arith.addf %370, %371 : vector<16x128xf32>
    %c0_129 = arith.constant 0 : index
    %c0_130 = arith.constant 0 : index
    %373 = vector.load %arg10[%c0_129, %c0_130] : memref<16x128xf32, #tpu.memory_space<vmem>>, vector<16x128xf32>
    tpu.vector_store %arg10[%c0_129, %c0_130], %372 {strides = array<i32>} : memref<16x128xf32, #tpu.memory_space<vmem>>, vector<16x128xf32>,
    return
  }
}

</mosaic_0001>

<bundles_post_ra>
// kernel: tpu_custom_call.1
= control target key start
LH: loop header
LB: loop body
LE: loop exit
PB: predicated region body
PF: predicated region fallthrough
CT: control target
= control target key end

     0   :  { %vm62_vm0 = vcmask 261120   ;;  %s3130_s0 = inlined_call_operand.vmem [shape: f32[16,32], index: 0, kind: input, shape index: {}]   ;;  %s3131_s1 = inlined_call_operand.vmem [shape: f32[16,16], index: 1, kind: input, shape index: {}]   ;;  %s3132_s2 = inlined_call_operand.vmem [shape: f32[32,128], index: 2, kind: input, shape index: {}]   ;;  %s3133_s3 = inlined_call_operand.vmem [shape: f32[128,8], index: 3, kind: input, shape index: {}]   ;;  %s3134_s4 = inlined_call_operand.vmem [shape: f32[8,128], index: 4, kind: input, shape index: {}]   ;;  %s3135_s5 = inlined_call_operand.vmem [shape: f32[1,128], index: 5, kind: input, shape index: {}]   ;;  %s3136_s6 = inlined_call_operand.vmem [shape: f32[128,128], index: 6, kind: input, shape index: {}]   ;;  %s3137_s7 = inlined_call_operand.vmem [shape: f32[128,1], index: 7, kind: input, shape index: {}]   ;;  %s3138_s8 = inlined_call_operand.vmem [shape: f32[1,128], index: 8, kind: input, shape index: {}]   ;;  %s3139_s9 = inlined_call_operand.vmem [shape: f32[1,128], index: 9, kind: input, shape index: {}]   ;;  %s3140_s10 = inlined_call_operand.hbm [shape: f32[16,128], index: 10, kind: output, shape index: {}]  }
   0x1   :  { %v40_v0 = vld [vmem:[%s3132_s2] sm:$0xff]  ;;  %v41_v1 = vld [vmem:[%s3132_s2 + $0x8] sm:$0xff]  ;;  %v42_v2 = vld [vmem:[%s3132_s2 + $0x10] sm:$0xff] }
   0x2   :  { %v2145_v3 = vpack.c.bf16 %v41_v1, %v40_v0  ;;  %v43_v4 = vld [vmem:[%s3132_s2 + $0x18] sm:$0xff]  ;;  %v36_v5 = vld [vmem:[%s3130_s0] sm:$0xff]  ;;  %v45_v8 = vld [vmem:[%s3133_s3 + $0x8] sm:$0xff] }
   0x3   :  { %v2149_v6 = vpack.c.bf16 %v43_v4, %v42_v2  ;;  %1960 = vmatprep.mubr.msk.f32.mxu0 %vm62_vm0, %v36_v5  ;;  %v44_v7 = vld [vmem:[%s3133_s3] sm:$0xff]  ;;  %v46_v9 = vld [vmem:[%s3133_s3 + $0x10] sm:$0xff]  ;;  %v47_v11 = vld [vmem:[%s3133_s3 + $0x18] sm:$0xff] }
   0x4   :  { %2146 = vmatprep.subr.bf16.mxu0 %v2145_v3  ;;  %v2153_v10 = vpack.c.bf16 %v45_v8, %v44_v7  ;;  %v2157_v12 = vpack.c.bf16 %v47_v11, %v46_v9  ;;  %v48_v13 = vld [vmem:[%s3133_s3 + $0x20] sm:$0xff]  ;;  %v49_v14 = vld [vmem:[%s3133_s3 + $0x28] sm:$0xff] }
   0x5   :  { %2148 = vmatpush3.bf16.msra.mxu0 %v2145_v3  ;;  %v2161_v15 = vpack.c.bf16 %v49_v14, %v48_v13 }
   0x6   :  { %2150 = vmatprep.subr.bf16.mxu0 %v2149_v6  ;;  %2154 = vmatprep.subr.bf16.mxu1 %v2153_v10 }
   0x7   :  { %2156 = vmatpush3.bf16.msra.mxu1 %v2153_v10 }
   0x8   :  { %2158 = vmatprep.subr.bf16.mxu1 %v2157_v12 }
   0x9   :  { %15 = vsyncpa [#allocation3], 0  ;;  %2152 = vmatpush3.bf16.msra.mxu0 %v2149_v6  ;;  %v37_v16 = vld [vmem:[%s3130_s0 + $0x8] sm:$0xff]  ;;  %v50_v17 = vld [vmem:[%s3133_s3 + $0x30] sm:$0xff]  ;;  %v2449_v32 = vmov 0.0|0.0   ;;  %vm2450_vm1 = vmmov 0   ;;  %v289_v35 = vlaneseq }
   0xa   :  { %v51_v18 = vld [vmem:[%s3133_s3 + $0x38] sm:$0xff]  ;;  %v52_v20 = vld [vmem:[%s3133_s3 + $0x40] sm:$0xff]  ;;  %v53_v21 = vld [vmem:[%s3133_s3 + $0x48] sm:$0xff]  ;;  %2185 = vmatprep.subr.bf16.mxu0 %v2449_v32  ;;  %v2451_v33 = vmov 0.0   ;;  %v2452_v34 = vmov 1   ;;  %v2453_v42 = vmov 0  }
   0xb   :  { %2160 = vmatpush3.bf16.msra.mxu1 %v2157_v12  ;;  %v2165_v19 = vpack.c.bf16 %v51_v18, %v50_v17  ;;  %v2169_v22 = vpack.c.bf16 %v53_v21, %v52_v20  ;;  %v54_v23 = vld [vmem:[%s3133_s3 + $0x50] sm:$0xff]  ;;  %v55_v24 = vld [vmem:[%s3133_s3 + $0x58] sm:$0xff]  ;;  %v56_v26 = vld [vmem:[%s3133_s3 + $0x60] sm:$0xff]  ;;  %2335 = vset.pattern.permute.xlu0 %v2452_v34  ;;  %v2589_v36 = vand.u32 127, %v289_v35  ;;  %v2454_v46 = vmov 2   ;;  %s2460_s30 = smov [#allocation2]  }
   0xc   :  { %1961 = vmatmul.mubr.msk.f32.vlgmr.msra.gmra.mrb[0].mxu0 %vm62_vm0, %v37_v16  ;;  %2162 = vmatprep.subr.bf16.mxu1 %v2161_v15  ;;  %v2173_v25 = vpack.c.bf16 %v55_v24, %v54_v23  ;;  %v57_v27 = vld [vmem:[%s3133_s3 + $0x68] sm:$0xff]  ;;  %v58_v29 = vld [vmem:[%s3133_s3 + $0x70] sm:$0xff]  ;;  %v59_v30 = vld [vmem:[%s3133_s3 + $0x78] sm:$0xff]  ;;  %v2455_v48 = vmov 3   ;;  %v2456_v49 = vmov 6   ;;  %v2457_v50 = vmov 4  }
   0xd   :  { %v2177_v28 = vpack.c.bf16 %v57_v27, %v56_v26  ;;  %v2181_v31 = vpack.c.bf16 %v59_v30, %v58_v29  ;;  %2002 = vmatprep.mubr.msk.f32.mxu0 %vm2450_vm1, %v2451_v33  ;;  %vm395_vm2 = vcmp.ge.s32.totalorder %v2589_v36, 16  ;;  %vm396_vm3 = vcmp.lt.s32.totalorder %v2589_v36, 32  ;;  %v60_v40 = vld [vmem:[%s3134_s4] sm:$0xff]  ;;  %2336 = vset.pattern.permute.xlu1 %v2453_v42  ;;  %v2622_v59 = vld [vmem:[%s3131_s1 + $0x8] sm:$0xff]  ;;  %s1799_s11 = sshll.u32 %s2460_s30, 4  ;;  %s1800_s11 = int_to_ptr.vmem [resolvable:$true] %s1799_s11 }
   0xe   :  { %vm397_vm4 = vmand %vm395_vm2, %vm396_vm3  ;;  %vm343_vm6 = vcmp.lt.s32.totalorder %v2589_v36, 16  ;;  %v2458_v51 = vmov 5   ;;  %v2459_v52 = vmov 7   ;;  %v2611_v53 = vshrl.u32 %v289_v35, 7  ;;  %v2633_v8 = vld [vmem:[%s3131_s1] sm:$0xff]  ;;  %s2425_s12 = scalar_lea.vmem %s1800_s11, 256  ;;  %p2430_p1 = scmp.lt.s32.totalorder %s1800_s11, %s1800_s11 }
   0xf   :  { %2164 = vmatpush3.bf16.msra.mxu1 %v2161_v15  ;;  %vm2189_vm5 = vmpackc.low %vm397_vm4, %vm397_vm4  ;;  %vm314_vm8 = vcmp.gt.f32.partialorder %v2622_v59, 0.0  ;;  %vm317_vm10 = vcmask 130048   ;;  %vm313_vm13 = vcmp.gt.f32.partialorder %v2633_v8, 0.0  ;;  %v1847_v59 = vld [vmem:[%s3139_s9] ss:$0 sm:$0xff]  ;;  %p2426_p0 = scmp.ne.s32.totalorder %s1800_s11, %s2425_s12  ;;  %p2431_p2 = scmp.lt.s32.totalorder %s2425_s12, %s2425_s12 }
  0x10   :  { %2166 = vmatprep.subr.bf16.mxu1 %v2165_v19  ;;  %vm2601_vm7 = vmpackc.low %vm343_vm6, %vm343_vm6  ;;  %v359_v54 = vsub.s32 1, %v2611_v53  ;;  %v303_v55 = vsub.s32 0, %v2611_v53  ;;  %v574_v1 = vsub.s32 2, %v2611_v53  ;;  %v710_v12 = vsub.s32 3, %v2611_v53 }
  0x11   :  { %v846_v35 = vsub.s32 4, %v2611_v53  ;;  %p2432_p3 = por %p2431_p2, %p2430_p1 }
  0x13   :  { %2168 = vmatpush3.bf16.msra.mxu1 %v2165_v19  ;;  %p2433_p4 = pnand %p2432_p3, %p2426_p0 }
  0x14   :  { %2170 = vmatprep.subr.bf16.mxu1 %v2169_v22 }
  0x17   :  { %2172 = vmatpush3.bf16.msra.mxu1 %v2169_v22 }
  0x18   :  { %2174 = vmatprep.subr.bf16.mxu1 %v2173_v25 }
  0x1b   :  { %2176 = vmatpush3.bf16.msra.mxu1 %v2173_v25 }
  0x1c   :  { %2178 = vmatprep.subr.bf16.mxu1 %v2177_v28 }
  0x1f   :  { %2180 = vmatpush3.bf16.msra.mxu1 %v2177_v28 }
  0x20   :  { %2182 = vmatprep.subr.bf16.mxu1 %v2181_v31 }
  0x23   :  { %2184 = vmatpush3.bf16.msra.mxu1 %v2181_v31 }
  0xdf   :  { %v1962_v37 = vpop.f32.mrb[0].mxu0 }
  0xe0   :  { %v135_v38 = vpop.f32.mrb[1].mxu0 }
  0xe1   :  { %v2593_v39 = vpack.c.bf16 %v1962_v37, %v135_v38  ;;  %1995 = vmatprep.mubr.f32.mxu1 %v135_v38 }
  0xe2   :  { %1996 = vmatmul.mubr.f32.vlgmr.msra.gmra.mrb[0].mxu1 %v1962_v37 }
  0xe3   :  { %2187 = vmatpush3.bf16.xpose.msra.mxu0 %v2593_v39 }
  0xe4   :  { %2190 = vmatprep.subr.msk.bf16.mxu0 %vm2189_vm5, %v2593_v39 }
  0xea   :  { %2003 = vmatmul.mubr.f32.vlgmr.msra.gmra.mrb[2].mxu0 %v60_v40 }
  0xeb   :  { %2193 = vmatpush3.bf16.msk.msra.mxu0 %vm2189_vm5, %v2593_v39 }
  0xec   :  { %2196 = vmatprep.subr.msk.bf16.mxu0 %vm2601_vm7, %v2593_v39 }
 0x1b5   :  { %v1997_v43 = vpop.f32.mrb[0].mxu1 }
 0x1b6   :  { %354 = vperm.xlu0 %2335, %v1997_v43   ;;  %v210_v44 = vpop.f32.mrb[1].mxu1 }
 0x1b7   :  { %293 = vperm.xlu1 %2336, %v210_v44  }
 0x1ba   :  { %350 = vperm.xlu0 %2335, %v210_v44  }
 0x1bb   :  { %298 = vperm.xlu1 %2336, %v1997_v43  }
 0x1bd   :  { %v2609_v45 = vpop.f32.mrb[2].mxu0 }
 0x1be   :  { %2338 = vset.pattern.permute.xlu0 %v2454_v46  ;;  %v2004_v47 = vpop.f32.mrb[3].mxu0  ;;  %v360_v56 = vrot.slane %v2609_v45, %v359_v54  ;;  %v304_v57 = vrot.slane %v2609_v45, %v303_v55  ;;  %v575_v11 = vrot.slane %v2609_v45, %v574_v1  ;;  %v711_v25 = vrot.slane %v2609_v45, %v710_v12 }
 0x1bf   :  { %2337 = vset.pattern.permute.xlu1 %v2454_v46  ;;  %565 = vperm.xlu0 %2338, %v210_v44   ;;  %v982_v46 = vsub.s32 5, %v2611_v53 }
 0x1c0   :  { %569 = vperm.xlu1 %2337, %v1997_v43  }
 0x1c3   :  { %2340 = vset.pattern.permute.xlu0 %v2455_v48 }
 0x1c4   :  { %2339 = vset.pattern.permute.xlu1 %v2455_v48  ;;  %705 = vperm.xlu0 %2340, %v1997_v43   ;;  %v847_v48 = vrot.slane %v2609_v45, %v846_v35 }
 0x1c5   :  { %701 = vperm.xlu1 %2339, %v210_v44  }
 0x1c8   :  { %2343 = vset.pattern.permute.xlu0 %v2456_v49 }
 0x1c9   :  { %2341 = vset.pattern.permute.xlu1 %v2457_v50  ;;  %1113 = vperm.xlu0 %2343, %v1997_v43   ;;  %v1118_v50 = vsub.s32 6, %v2611_v53 }
 0x1ca   :  { %837 = vperm.xlu1 %2341, %v210_v44  }
 0x1cb   :  { %v1119_v1 = vrot.slane %v2609_v45, %v1118_v50 }
 0x1cd   :  { %2344 = vset.pattern.permute.xlu0 %v2458_v51 }
 0x1ce   :  { %841 = vperm.xlu1 %2341, %v1997_v43   ;;  %973 = vperm.xlu0 %2344, %v210_v44  }
 0x1d2   :  { %2342 = vset.pattern.permute.xlu1 %v2458_v51  ;;  %2348 = vset.pattern.permute.xlu0 %v2453_v42 }
 0x1d3   :  { %977 = vperm.xlu1 %2342, %v1997_v43  }
 0x1d7   :  { %2345 = vset.pattern.permute.xlu1 %v2456_v49 }
 0x1d8   :  { %1109 = vperm.xlu1 %2345, %v210_v44  }
 0x1dc   :  { %2346 = vset.pattern.permute.xlu1 %v2459_v52 }
 0x1dd   :  { %1249 = vperm.xlu1 %2346, %v1997_v43  }
 0x1e1   :  { %1245 = vperm.xlu1 %2346, %v210_v44  }
 0x1e5   :  { %2347 = vset.pattern.permute.xlu1 %v2453_v42 }
 0x235   :  { %v355_v58 = vpop.permute.xlu0 %354 }
 0x236   :  { %v362_v60 = vadd.f32 %v360_v56, %v355_v58  ;;  %v294_v61 = vpop.permute.xlu1 %293 }
 0x237   :  { %v305_v62 = vadd.f32 %v304_v57, %v294_v61  ;;  %v983_v61 = vrot.slane %v2609_v45, %v982_v46 }
 0x238   :  { %v366_v63 = vmul.f32 0.2, %v362_v60  ;;  %vm364_vm9 = vcmp.gt.f32.partialorder %v362_v60, 0.0 }
 0x239   :  { %v351_v0 = vpop.permute.xlu0 %350  ;;  %v309_v2 = vmul.f32 0.2, %v305_v62  ;;  %vm307_vm11 = vcmp.gt.f32.partialorder %v305_v62, 0.0 }
 0x23a   :  { %v361_v3 = vadd.f32 %v360_v56, %v351_v0  ;;  %v299_v4 = vpop.permute.xlu1 %298  ;;  %v368_v5 = vsel %vm364_vm9, %v362_v60, %v366_v63 }
 0x23b   :  { %v306_v6 = vadd.f32 %v304_v57, %v299_v4  ;;  %v2628_v7 = vsel %vm314_vm8, %v368_v5, -1e+30  ;;  %v311_v16 = vsel %vm307_vm11, %v305_v62, %v309_v2 }
 0x23c   :  { %v365_v9 = vmul.f32 0.2, %v361_v3  ;;  %v374_v10 = vsel %vm317_vm10, %v2628_v7, -inf  ;;  %vm363_vm12 = vcmp.gt.f32.partialorder %v361_v3, 0.0  ;;  %v2648_v23 = vsel %vm313_vm13, %v311_v16, -1e+30 }
 0x23d   :  { %375 = vmax.xlane.f32.xlu1 %v374_v10  ;;  %v310_v13 = vmul.f32 0.2, %v306_v6  ;;  %vm308_vm14 = vcmp.gt.f32.partialorder %v306_v6, 0.0  ;;  %v318_v31 = vsel %vm317_vm10, %v2648_v23, -inf }
 0x23e   :  { %v566_v14 = vpop.permute.xlu0 %565  ;;  %v367_v15 = vsel %vm363_vm12, %v361_v3, %v365_v9 }
 0x23f   :  { %v576_v17 = vadd.f32 %v575_v11, %v566_v14  ;;  %v570_v18 = vpop.permute.xlu1 %569  ;;  %v2642_v19 = vsel %vm313_vm13, %v367_v15, -1e+30  ;;  %v312_v26 = vsel %vm308_vm14, %v306_v6, %v310_v13 }
 0x240   :  { %v577_v20 = vadd.f32 %v575_v11, %v570_v18  ;;  %v371_v21 = vsel %vm317_vm10, %v2642_v19, -inf  ;;  %v2662_v40 = vsel %vm314_vm8, %v312_v26, -1e+30 }
 0x241   :  { %v580_v22 = vmul.f32 0.2, %v576_v17  ;;  %372 = vmax.xlane.f32.xlu0 %v371_v21  ;;  %vm578_vm15 = vcmp.gt.f32.partialorder %v576_v17, 0.0  ;;  %v321_v49 = vsel %vm317_vm10, %v2662_v40, -inf }
 0x242   :  { %v581_v24 = vmul.f32 0.2, %v577_v20  ;;  %vm579_vm0 = vcmp.gt.f32.partialorder %v577_v20, 0.0 }
 0x243   :  { %v706_v27 = vpop.permute.xlu0 %705  ;;  %v582_v28 = vsel %vm578_vm15, %v576_v17, %v580_v22 }
 0x244   :  { %v713_v29 = vadd.f32 %v711_v25, %v706_v27  ;;  %v702_v30 = vpop.permute.xlu1 %701  ;;  %v2655_v34 = vsel %vm313_vm13, %v582_v28, -1e+30  ;;  %v583_v43 = vsel %vm579_vm0, %v577_v20, %v581_v24  ;;  %vm610_vm0 = vcmp.ge.s32.totalorder %v2589_v36, 32 }
 0x245   :  { %v712_v37 = vadd.f32 %v711_v25, %v702_v30  ;;  %319 = vmax.xlane.f32.xlu0 %v318_v31  ;;  %v586_v38 = vsel %vm317_vm10, %v2655_v34, -inf  ;;  %v2671_v54 = vsel %vm314_vm8, %v583_v43, -1e+30 }
 0x246   :  { %v717_v42 = vmul.f32 0.2, %v713_v29  ;;  %587 = vmax.xlane.f32.xlu1 %v586_v38  ;;  %vm715_vm2 = vcmp.gt.f32.partialorder %v713_v29, 0.0  ;;  %v589_v63 = vsel %vm317_vm10, %v2671_v54, -inf }
 0x247   :  { %v716_v44 = vmul.f32 0.2, %v712_v37  ;;  %vm714_vm3 = vcmp.gt.f32.partialorder %v712_v37, 0.0 }
 0x248   :  { %v1114_v47 = vpop.permute.xlu0 %1113  ;;  %v719_v56 = vsel %vm715_vm2, %v713_v29, %v717_v42  ;;  %v1254_v29 = vsub.s32 7, %v2611_v53  ;;  %vm611_vm2 = vcmp.lt.s32.totalorder %v2589_v36, 48 }
 0x249   :  { %v838_v51 = vpop.permute.xlu1 %837  ;;  %322 = vmax.xlane.f32.xlu0 %v321_v49  ;;  %v718_v52 = vsel %vm714_vm3, %v712_v37, %v716_v44  ;;  %v2684_v0 = vsel %vm314_vm8, %v719_v56, -1e+30  ;;  %v1121_v9 = vadd.f32 %v1119_v1, %v1114_v47  ;;  %vm2871_vm3 = vmand %vm610_vm0, %vm611_vm2  ;;  %vm1018_vm0 = vcmp.ge.s32.totalorder %v2589_v36, 80 }
 0x24a   :  { %v848_v57 = vadd.f32 %v847_v48, %v838_v51  ;;  %v2675_v58 = vsel %vm313_vm13, %v718_v52, -1e+30  ;;  %v725_v11 = vsel %vm317_vm10, %v2684_v0, -inf  ;;  %v1255_v43 = vrot.slane %v2609_v45, %v1254_v29 }
 0x24b   :  { %v722_v60 = vsel %vm317_vm10, %v2675_v58, -inf  ;;  %v1125_v18 = vmul.f32 0.2, %v1121_v9  ;;  %vm1123_vm9 = vcmp.gt.f32.partialorder %v1121_v9, 0.0  ;;  %vm1019_vm2 = vcmp.lt.s32.totalorder %v2589_v36, 96 }
 0x24c   :  { %v852_v62 = vmul.f32 0.2, %v848_v57  ;;  %723 = vmax.xlane.f32.xlu1 %v722_v60  ;;  %vm850_vm4 = vcmp.gt.f32.partialorder %v848_v57, 0.0 }
 0x24d   :  { %v842_v2 = vpop.permute.xlu1 %841  ;;  %590 = vmax.xlane.f32.xlu0 %v589_v63  ;;  %v974_v3 = vpop.permute.xlu0 %973  ;;  %v1127_v30 = vsel %vm1123_vm9, %v1121_v9, %v1125_v18 }
 0x24e   :  { %v849_v4 = vadd.f32 %v847_v48, %v842_v2  ;;  %v984_v5 = vadd.f32 %v983_v61, %v974_v3  ;;  %v854_v6 = vsel %vm850_vm4, %v848_v57, %v852_v62  ;;  %v2716_v42 = vsel %vm314_vm8, %v1127_v30, -1e+30  ;;  %vm2201_vm4 = vmpackc.low %vm2871_vm3, %vm2871_vm3 }
 0x24f   :  { %v2689_v10 = vsel %vm313_vm13, %v854_v6, -1e+30  ;;  %v1133_v48 = vsel %vm317_vm10, %v2716_v42, -inf  ;;  %vm2945_vm3 = vmand %vm1018_vm0, %vm1019_vm2 }
 0x250   :  { %v853_v12 = vmul.f32 0.2, %v849_v4  ;;  %v988_v13 = vmul.f32 0.2, %v984_v5  ;;  %v858_v14 = vsel %vm317_vm10, %v2689_v10, -inf  ;;  %vm851_vm5 = vcmp.gt.f32.partialorder %v849_v4, 0.0 }
 0x251   :  { %859 = vmax.xlane.f32.xlu1 %v858_v14  ;;  %726 = vmax.xlane.f32.xlu0 %v725_v11  ;;  %vm986_vm6 = vcmp.gt.f32.partialorder %v984_v5, 0.0 }
 0x252   :  { %v978_v15 = vpop.permute.xlu1 %977  ;;  %v855_v16 = vsel %vm851_vm5, %v849_v4, %v853_v12  ;;  %v990_v17 = vsel %vm986_vm6, %v984_v5, %v988_v13  ;;  %vm746_vm5 = vcmp.ge.s32.totalorder %v2589_v36, 48  ;;  %vm747_vm6 = vcmp.lt.s32.totalorder %v2589_v36, 64 }
 0x253   :  { %v985_v20 = vadd.f32 %v983_v61, %v978_v15  ;;  %v2697_v21 = vsel %vm314_vm8, %v855_v16, -1e+30  ;;  %v2701_v22 = vsel %vm313_vm13, %v990_v17, -1e+30  ;;  %vm2895_vm9 = vmand %vm746_vm5, %vm747_vm6  ;;  %vm1154_vm5 = vcmp.ge.s32.totalorder %v2589_v36, 96 }
 0x254   :  { %v861_v24 = vsel %vm317_vm10, %v2697_v21, -inf  ;;  %v994_v25 = vsel %vm317_vm10, %v2701_v22, -inf  ;;  %vm1155_vm6 = vcmp.lt.s32.totalorder %v2589_v36, 112 }
 0x255   :  { %v989_v26 = vmul.f32 0.2, %v985_v20  ;;  %862 = vmax.xlane.f32.xlu0 %v861_v24  ;;  %995 = vmax.xlane.f32.xlu1 %v994_v25  ;;  %vm987_vm11 = vcmp.gt.f32.partialorder %v985_v20, 0.0 }
 0x257   :  { %v1110_v27 = vpop.permute.xlu1 %1109  ;;  %v991_v28 = vsel %vm987_vm11, %v985_v20, %v989_v26  ;;  %vm882_vm11 = vcmp.ge.s32.totalorder %v2589_v36, 64 }
 0x258   :  { %v1120_v31 = vadd.f32 %v1119_v1, %v1110_v27  ;;  %v2710_v35 = vsel %vm314_vm8, %v991_v28, -1e+30 }
 0x259   :  { %v997_v37 = vsel %vm317_vm10, %v2710_v35, -inf }
 0x25a   :  { %v1124_v38 = vmul.f32 0.2, %v1120_v31  ;;  %998 = vmax.xlane.f32.xlu0 %v997_v37  ;;  %vm1122_vm12 = vcmp.gt.f32.partialorder %v1120_v31, 0.0 }
 0x25c   :  { %v1250_v44 = vpop.permute.xlu1 %1249  ;;  %v1126_v46 = vsel %vm1122_vm12, %v1120_v31, %v1124_v38  ;;  %vm883_vm12 = vcmp.lt.s32.totalorder %v2589_v36, 80 }
 0x25d   :  { %v1257_v47 = vadd.f32 %v1255_v43, %v1250_v44  ;;  %v2723_v49 = vsel %vm313_vm13, %v1126_v46, -1e+30 }
 0x25e   :  { %1134 = vmax.xlane.f32.xlu0 %v1133_v48  ;;  %v1130_v50 = vsel %vm317_vm10, %v2723_v49, -inf }
 0x25f   :  { %v1261_v51 = vmul.f32 0.2, %v1257_v47  ;;  %1131 = vmax.xlane.f32.xlu1 %v1130_v50  ;;  %vm1259_vm14 = vcmp.gt.f32.partialorder %v1257_v47, 0.0 }
 0x260   :  { %v1246_v52 = vpop.permute.xlu1 %1245 }
 0x261   :  { %v1256_v56 = vadd.f32 %v1255_v43, %v1246_v52  ;;  %v1263_v45 = vsel %vm1259_vm14, %v1257_v47, %v1261_v51  ;;  %vm2920_vm14 = vmand %vm882_vm11, %vm883_vm12  ;;  %vm1290_vm11 = vcmp.ge.s32.totalorder %v2589_v36, 112 }
 0x262   :  { %v2729_v57 = vsel %vm314_vm8, %v1263_v45, -1e+30  ;;  %vm2231_vm12 = vmpackc.low %vm1290_vm11, %vm1290_vm11 }
 0x263   :  { %v1260_v60 = vmul.f32 0.2, %v1256_v56  ;;  %v1269_v61 = vsel %vm317_vm10, %v2729_v57, -inf  ;;  %vm1258_vm15 = vcmp.gt.f32.partialorder %v1256_v56, 0.0 }
 0x264   :  { %1270 = vmax.xlane.f32.xlu0 %v1269_v61 }
 0x265   :  { %v1262_v62 = vsel %vm1258_vm15, %v1256_v56, %v1260_v60  ;;  %vm2213_vm15 = vmpackc.low %vm2920_vm14, %vm2920_vm14 }
 0x266   :  { %v2735_v63 = vsel %vm313_vm13, %v1262_v62, -1e+30 }
 0x267   :  { %v1266_v1 = vsel %vm317_vm10, %v2735_v63, -inf }
 0x268   :  { %1267 = vmax.xlane.f32.xlu1 %v1266_v1 }
 0x2ca   :  { %v376_v2 = vpop.xlane.xlu1 %375 }
 0x2cb   :  { %v378_v3 = vsub.f32 %v2628_v7, %v376_v2 }
 0x2cd   :  { %v381_v4 = vmul.f32 1.442695, %v378_v3 }
 0x2ce   :  { %v373_v5 = vpop.xlane.xlu0 %372 }
 0x2cf   :  { %2349 = vpow2.f32 %v381_v4  ;;  %v377_v6 = vsub.f32 %v2642_v19, %v373_v5 }
 0x2d1   :  { %v379_v9 = vmul.f32 1.442695, %v377_v6 }
 0x2d2   :  { %v320_v11 = vpop.xlane.xlu0 %319 }
 0x2d3   :  { %2351 = vpow2.f32 %v379_v9  ;;  %v324_v12 = vsub.f32 %v2648_v23, %v320_v11  ;;  %v588_v13 = vpop.xlane.xlu1 %587 }
 0x2d4   :  { %v592_v14 = vsub.f32 %v2655_v34, %v588_v13 }
 0x2d5   :  { %v326_v15 = vmul.f32 1.442695, %v324_v12 }
 0x2d6   :  { %v594_v16 = vmul.f32 1.442695, %v592_v14  ;;  %v323_v17 = vpop.xlane.xlu0 %322 }
 0x2d7   :  { %2353 = vpow2.f32 %v326_v15  ;;  %v325_v18 = vsub.f32 %v2662_v40, %v323_v17 }
 0x2d8   :  { %2355 = vpow2.f32 %v594_v16 }
 0x2d9   :  { %v2350_v7 = vpop.eup %2349  ;;  %v328_v20 = vmul.f32 1.442695, %v325_v18  ;;  %v724_v24 = vpop.xlane.xlu1 %723 }
 0x2da   :  { %v728_v19 = vsub.f32 %v2675_v58, %v724_v24  ;;  %v591_v25 = vpop.xlane.xlu0 %590  ;;  %v2747_v26 = vsel %vm314_vm8, %v2350_v7, 0.0 }
 0x2db   :  { %2357 = vpow2.f32 %v328_v20  ;;  %v593_v23 = vsub.f32 %v2671_v54, %v591_v25  ;;  %v388_v34 = vsel %vm317_vm10, %v2747_v26, 0.0 }
 0x2dc   :  { %v730_v27 = vmul.f32 1.442695, %v728_v19  ;;  %389 = vadd.xlane.f32.xlu0 %v388_v34 }
 0x2dd   :  { %v2352_v40 = vpop.eup %2351  ;;  %v596_v28 = vmul.f32 1.442695, %v593_v23 }
 0x2de   :  { %2359 = vpow2.f32 %v730_v27  ;;  %v860_v29 = vpop.xlane.xlu1 %859  ;;  %v727_v30 = vpop.xlane.xlu0 %726  ;;  %v2754_v58 = vsel %vm313_vm13, %v2352_v40, 0.0 }
 0x2df   :  { %2361 = vpow2.f32 %v596_v28  ;;  %v864_v31 = vsub.f32 %v2689_v10, %v860_v29  ;;  %v729_v37 = vsub.f32 %v2684_v0, %v727_v30  ;;  %v385_v54 = vsel %vm317_vm10, %v2754_v58, 0.0 }
 0x2e0   :  { %386 = vadd.xlane.f32.xlu1 %v385_v54 }
 0x2e1   :  { %v2354_v38 = vpop.eup %2353  ;;  %v866_v43 = vmul.f32 1.442695, %v864_v31  ;;  %v732_v44 = vmul.f32 1.442695, %v729_v37 }
 0x2e2   :  { %v2356_v46 = vpop.eup %2355  ;;  %v996_v47 = vpop.xlane.xlu1 %995  ;;  %v2762_v50 = vsel %vm313_vm13, %v2354_v38, 0.0 }
 0x2e3   :  { %v863_v48 = vpop.xlane.xlu0 %862  ;;  %2363 = vpow2.f32 %v866_v43  ;;  %v1000_v51 = vsub.f32 %v2701_v22, %v996_v47  ;;  %v332_v0 = vsel %vm317_vm10, %v2762_v50, 0.0  ;;  %v2770_v52 = vsel %vm313_vm13, %v2356_v46, 0.0 }
 0x2e4   :  { %v865_v10 = vsub.f32 %v2697_v21, %v863_v48  ;;  %2365 = vpow2.f32 %v732_v44  ;;  %333 = vadd.xlane.f32.xlu1 %v332_v0  ;;  %v600_v21 = vsel %vm317_vm10, %v2770_v52, 0.0 }
 0x2e5   :  { %v2358_v56 = vpop.eup %2357  ;;  %v1002_v45 = vmul.f32 1.442695, %v1000_v51 }
 0x2e6   :  { %v868_v60 = vmul.f32 1.442695, %v865_v10  ;;  %v2774_v61 = vsel %vm314_vm8, %v2358_v56, 0.0 }
 0x2e7   :  { %2367 = vpow2.f32 %v1002_v45  ;;  %v999_v22 = vpop.xlane.xlu0 %998  ;;  %v335_v62 = vsel %vm317_vm10, %v2774_v61, 0.0 }
 0x2e8   :  { %v2360_v1 = vpop.eup %2359  ;;  %2369 = vpow2.f32 %v868_v60  ;;  %v1001_v2 = vsub.f32 %v2710_v35, %v999_v22  ;;  %601 = vadd.xlane.f32.xlu1 %v600_v21  ;;  %336 = vadd.xlane.f32.xlu0 %v335_v62  ;;  %v1398_v22 = vld [vmem:[%s3136_s6] sm:$0xff]  ;;  %v1399_v21 = vld [vmem:[%s3136_s6 + $0x8] sm:$0xff]  ;;  %v1400_v62 = vld [vmem:[%s3136_s6 + $0x10] sm:$0xff] }
 0x2e9   :  { %v2362_v3 = vpop.eup %2361  ;;  %v2783_v4 = vsel %vm313_vm13, %v2360_v1, 0.0  ;;  %v2236_v1 = vpack.c.bf16 %v1399_v21, %v1398_v22 }
 0x2ea   :  { %v1004_v5 = vmul.f32 1.442695, %v1001_v2  ;;  %v736_v6 = vsel %vm317_vm10, %v2783_v4, 0.0  ;;  %v2789_v9 = vsel %vm314_vm8, %v2362_v3, 0.0  ;;  %v1401_v2 = vld [vmem:[%s3136_s6 + $0x18] sm:$0xff] }
 0x2eb   :  { %v1135_v11 = vpop.xlane.xlu0 %1134  ;;  %v603_v12 = vsel %vm317_vm10, %v2789_v9, 0.0  ;;  %v2240_v3 = vpack.c.bf16 %v1401_v2, %v1400_v62  ;;  %2237 = vmatprep.subr.bf16.mxu1 %v2236_v1 }
 0x2ec   :  { %2371 = vpow2.f32 %v1004_v5  ;;  %v1137_v35 = vsub.f32 %v2716_v42, %v1135_v11  ;;  %v1132_v13 = vpop.xlane.xlu1 %1131  ;;  %737 = vadd.xlane.f32.xlu1 %v736_v6  ;;  %604 = vadd.xlane.f32.xlu0 %v603_v12  ;;  %v1402_v5 = vld [vmem:[%s3136_s6 + $0x20] sm:$0xff]  ;;  %v1403_v6 = vld [vmem:[%s3136_s6 + $0x28] sm:$0xff] }
 0x2ed   :  { %v2364_v14 = vpop.eup %2363  ;;  %v1136_v15 = vsub.f32 %v2723_v49, %v1132_v13  ;;  %2239 = vmatpush3.bf16.msra.mxu1 %v2236_v1  ;;  %v2244_v11 = vpack.c.bf16 %v1403_v6, %v1402_v5 }
 0x2ee   :  { %v2366_v16 = vpop.eup %2365  ;;  %v1140_v17 = vmul.f32 1.442695, %v1137_v35  ;;  %v2797_v18 = vsel %vm313_vm13, %v2364_v14, 0.0  ;;  %2241 = vmatprep.subr.bf16.mxu1 %v2240_v3 }
 0x2ef   :  { %v1138_v7 = vmul.f32 1.442695, %v1136_v15  ;;  %v872_v20 = vsel %vm317_vm10, %v2797_v18, 0.0  ;;  %v2803_v24 = vsel %vm314_vm8, %v2366_v16, 0.0 }
 0x2f0   :  { %2373 = vpow2.f32 %v1140_v17  ;;  %873 = vadd.xlane.f32.xlu1 %v872_v20  ;;  %v739_v42 = vsel %vm317_vm10, %v2803_v24, 0.0 }
 0x2f1   :  { %v2368_v49 = vpop.eup %2367  ;;  %2375 = vpow2.f32 %v1138_v7  ;;  %740 = vadd.xlane.f32.xlu0 %v739_v42  ;;  %v1271_v19 = vpop.xlane.xlu0 %1270  ;;  %2243 = vmatpush3.bf16.msra.mxu1 %v2240_v3  ;;  %v1412_v7 = vld [vmem:[%s3136_s6 + $0x70] sm:$0xff] }
 0x2f2   :  { %v2370_v25 = vpop.eup %2369  ;;  %v1273_v23 = vsub.f32 %v2729_v57, %v1271_v19  ;;  %v2810_v34 = vsel %vm313_vm13, %v2368_v49, 0.0  ;;  %2245 = vmatprep.subr.bf16.mxu1 %v2244_v11 }
 0x2f3   :  { %v1008_v27 = vsel %vm317_vm10, %v2810_v34, 0.0  ;;  %v2816_v40 = vsel %vm314_vm8, %v2370_v25, 0.0 }
 0x2f4   :  { %v1276_v28 = vmul.f32 1.442695, %v1273_v23  ;;  %1009 = vadd.xlane.f32.xlu1 %v1008_v27  ;;  %v875_v29 = vsel %vm317_vm10, %v2816_v40, 0.0 }
 0x2f5   :  { %876 = vadd.xlane.f32.xlu0 %v875_v29  ;;  %v1268_v30 = vpop.xlane.xlu1 %1267  ;;  %2247 = vmatpush3.bf16.msra.mxu1 %v2244_v11  ;;  %v1404_v11 = vld [vmem:[%s3136_s6 + $0x30] sm:$0xff] }
 0x2f6   :  { %v2372_v31 = vpop.eup %2371  ;;  %2377 = vpow2.f32 %v1276_v28  ;;  %v1272_v57 = vsub.f32 %v2735_v63, %v1268_v30 }
 0x2f7   :  { %v2823_v37 = vsel %vm314_vm8, %v2372_v31, 0.0 }
 0x2f8   :  { %v1274_v54 = vmul.f32 1.442695, %v1272_v57  ;;  %v1011_v38 = vsel %vm317_vm10, %v2823_v37, 0.0 }
 0x2f9   :  { %1012 = vadd.xlane.f32.xlu0 %v1011_v38 }
 0x2fa   :  { %v2374_v43 = vpop.eup %2373  ;;  %2379 = vpow2.f32 %v1274_v54 }
 0x2fb   :  { %v2376_v44 = vpop.eup %2375  ;;  %v2829_v46 = vsel %vm314_vm8, %v2374_v43, 0.0  ;;  %v1428_v43 = vld [vmem:[%s3137_s7 + $0x70] sm:$0xff] }
 0x2fc   :  { %v1147_v47 = vsel %vm317_vm10, %v2829_v46, 0.0  ;;  %v2835_v63 = vsel %vm313_vm13, %v2376_v44, 0.0 }
 0x2fd   :  { %1148 = vadd.xlane.f32.xlu0 %v1147_v47  ;;  %v1144_v48 = vsel %vm317_vm10, %v2835_v63, 0.0 }
 0x2fe   :  { %1145 = vadd.xlane.f32.xlu1 %v1144_v48 }
 0x300   :  { %v2378_v51 = vpop.eup %2377 }
 0x301   :  { %v2841_v10 = vsel %vm314_vm8, %v2378_v51, 0.0 }
 0x302   :  { %v1283_v0 = vsel %vm317_vm10, %v2841_v10, 0.0 }
 0x303   :  { %1284 = vadd.xlane.f32.xlu0 %v1283_v0 }
 0x304   :  { %v2380_v56 = vpop.eup %2379 }
 0x305   :  { %v2847_v45 = vsel %vm313_vm13, %v2380_v56, 0.0 }
 0x306   :  { %v1280_v60 = vsel %vm317_vm10, %v2847_v45, 0.0 }
 0x307   :  { %1281 = vadd.xlane.f32.xlu1 %v1280_v60 }
 0x369   :  { %v390_v12 = vpop.xlane.xlu0 %389 }
 0x36a   :  { %2381 = vrcp.f32 %v390_v12 }
 0x36d   :  { %v387_v35 = vpop.xlane.xlu1 %386 }
 0x36e   :  { %2383 = vrcp.f32 %v387_v35  ;;  %v1408_v35 = vld [vmem:[%s3136_s6 + $0x50] sm:$0xff] }
 0x371   :  { %v334_v13 = vpop.xlane.xlu1 %333 }
 0x372   :  { %2385 = vrcp.f32 %v334_v13  ;;  %v1409_v13 = vld [vmem:[%s3136_s6 + $0x58] sm:$0xff] }
 0x374   :  { %v2382_v16 = vpop.eup %2381 }
 0x375   :  { %v602_v14 = vpop.xlane.xlu1 %601  ;;  %v337_v15 = vpop.xlane.xlu0 %336  ;;  %v394_v42 = vmul.f32 %v2382_v16, %v2747_v26  ;;  %v1411_v16 = vld [vmem:[%s3136_s6 + $0x68] sm:$0xff] }
 0x376   :  { %2387 = vrcp.f32 %v602_v14  ;;  %v1410_v14 = vld [vmem:[%s3136_s6 + $0x60] sm:$0xff] }
 0x377   :  { %2389 = vrcp.f32 %v337_v15  ;;  %v2256_v15 = vpack.c.bf16 %v1409_v13, %v1408_v35 }
 0x378   :  { %v2384_v17 = vpop.eup %2383 }
 0x379   :  { %v392_v20 = vmul.f32 %v2384_v17, %v2754_v58  ;;  %v605_v49 = vpop.xlane.xlu0 %604  ;;  %v738_v19 = vpop.xlane.xlu1 %737  ;;  %v2260_v17 = vpack.c.bf16 %v1411_v16, %v1410_v14 }
 0x37a   :  { %2391 = vrcp.f32 %v605_v49  ;;  %v1414_v49 = vld [vmem:[%s3137_s7] sm:$0xff] }
 0x37b   :  { %2009 = vmatprep.mubr.msk.f32.mxu0 %vm317_vm10, %v392_v20  ;;  %2393 = vrcp.f32 %v738_v19  ;;  %v1413_v20 = vld [vmem:[%s3136_s6 + $0x78] sm:$0xff]  ;;  %v1415_v19 = vld [vmem:[%s3137_s7 + $0x8] sm:$0xff] }
 0x37c   :  { %v2386_v25 = vpop.eup %2385  ;;  %2010 = vmatmul.mubr.msk.f32.vlgmr.msra.gmra.mrb[4].mxu0 %vm317_vm10, %v394_v42  ;;  %v2264_v42 = vpack.c.bf16 %v1413_v20, %v1412_v7 }
 0x37d   :  { %2199 = vmatpush3.bf16.msk.msra.mxu0 %vm2601_vm7, %v2593_v39  ;;  %v339_v58 = vmul.f32 %v2386_v25, %v2762_v50  ;;  %v874_v28 = vpop.xlane.xlu1 %873  ;;  %vm2207_vm7 = vmpackc.low %vm2895_vm9, %vm2895_vm9  ;;  %v1416_v25 = vld [vmem:[%s3137_s7 + $0x10] sm:$0xff] }
 0x37e   :  { %2202 = vmatprep.subr.msk.bf16.mxu0 %vm2201_vm4, %v2593_v39  ;;  %v741_v27 = vpop.xlane.xlu0 %740  ;;  %vm2970_vm9 = vmand %vm1154_vm5, %vm1155_vm6 }
 0x37f   :  { %2016 = vmatprep.mubr.msk.f32.mxu0 %vm317_vm10, %v339_v58  ;;  %2395 = vrcp.f32 %v741_v27  ;;  %v2268_v58 = vpack.c.bf16 %v1415_v19, %v1414_v49  ;;  %v1420_v27 = vld [vmem:[%s3137_s7 + $0x30] sm:$0xff] }
 0x380   :  { %v2388_v26 = vpop.eup %2387  ;;  %2397 = vrcp.f32 %v874_v28  ;;  %v1421_v28 = vld [vmem:[%s3137_s7 + $0x38] sm:$0xff] }
 0x381   :  { %v2390_v50 = vpop.eup %2389  ;;  %v607_v29 = vmul.f32 %v2388_v26, %v2770_v52  ;;  %v1010_v54 = vpop.xlane.xlu1 %1009  ;;  %v1417_v26 = vld [vmem:[%s3137_s7 + $0x18] sm:$0xff] }
 0x382   :  { %v341_v23 = vmul.f32 %v2390_v50, %v2774_v61  ;;  %v877_v57 = vpop.xlane.xlu0 %876  ;;  %v2272_v41 = vpack.c.bf16 %v1417_v26, %v1416_v25  ;;  %v1419_v50 = vld [vmem:[%s3137_s7 + $0x28] sm:$0xff] }
 0x383   :  { %2399 = vrcp.f32 %v877_v57  ;;  %v1425_v57 = vld [vmem:[%s3137_s7 + $0x58] sm:$0xff] }
 0x384   :  { %2017 = vmatmul.mubr.msk.f32.vlgmr.msra.gmra.mrb[4].mxu0 %vm317_vm10, %v341_v23  ;;  %v2392_v52 = vpop.eup %2391  ;;  %2401 = vrcp.f32 %v1010_v54 }
 0x385   :  { %2205 = vmatpush3.bf16.msk.msra.mxu0 %vm2201_vm4, %v2593_v39  ;;  %2023 = vmatprep.mubr.msk.f32.mxu0 %vm317_vm10, %v607_v29  ;;  %v2394_v61 = vpop.eup %2393  ;;  %v609_v31 = vmul.f32 %v2392_v52, %v2789_v9  ;;  %vm2219_vm4 = vmpackc.low %vm2945_vm3, %vm2945_vm3  ;;  %v2280_v29 = vpack.c.bf16 %v1421_v28, %v1420_v27  ;;  %v1422_v52 = vld [vmem:[%s3137_s7 + $0x40] sm:$0xff] }
 0x386   :  { %2208 = vmatprep.subr.msk.bf16.mxu0 %vm2207_vm7, %v2593_v39  ;;  %v743_v38 = vmul.f32 %v2394_v61, %v2783_v4  ;;  %v1013_v47 = vpop.xlane.xlu0 %1012  ;;  %v1423_v61 = vld [vmem:[%s3137_s7 + $0x48] sm:$0xff] }
 0x387   :  { %2403 = vrcp.f32 %v1013_v47  ;;  %v2284_v30 = vpack.c.bf16 %v1423_v61, %v1422_v52 }
 0x389   :  { %v2396_v4 = vpop.eup %2395 }
 0x38a   :  { %v2398_v9 = vpop.eup %2397  ;;  %v745_v44 = vmul.f32 %v2396_v4, %v2803_v24  ;;  %v1149_v60 = vpop.xlane.xlu0 %1148  ;;  %v1427_v4 = vld [vmem:[%s3137_s7 + $0x68] sm:$0xff] }
 0x38b   :  { %v1146_v48 = vpop.xlane.xlu1 %1145  ;;  %v879_v51 = vmul.f32 %v2398_v9, %v2797_v18 }
 0x38c   :  { %2024 = vmatmul.mubr.msk.f32.vlgmr.msra.gmra.mrb[4].mxu0 %vm317_vm10, %v609_v31  ;;  %2405 = vrcp.f32 %v1146_v48  ;;  %v1424_v31 = vld [vmem:[%s3137_s7 + $0x50] sm:$0xff]  ;;  %v1844_v48 = vld [vmem:[%s3135_s5] ss:$0 sm:$0xff] }
 0x38d   :  { %2211 = vmatpush3.bf16.msk.msra.mxu0 %vm2207_vm7, %v2593_v39  ;;  %2030 = vmatprep.mubr.msk.f32.mxu0 %vm317_vm10, %v743_v38  ;;  %v2400_v18 = vpop.eup %2399  ;;  %vm2225_vm7 = vmpackc.low %vm2970_vm9, %vm2970_vm9  ;;  %2407 = vrcp.f32 %v1149_v60  ;;  %v2288_v54 = vpack.c.bf16 %v1425_v57, %v1424_v31  ;;  %v1426_v38 = vld [vmem:[%s3137_s7 + $0x60] sm:$0xff] }
 0x38e   :  { %2214 = vmatprep.subr.msk.bf16.mxu0 %vm2213_vm15, %v2593_v39  ;;  %v2402_v24 = vpop.eup %2401  ;;  %v881_v56 = vmul.f32 %v2400_v18, %v2816_v40  ;;  %v2292_v9 = vpack.c.bf16 %v1427_v4, %v1426_v38 }
 0x38f   :  { %v1015_v21 = vmul.f32 %v2402_v24, %v2810_v34 }
 0x390   :  { %v1285_v1 = vpop.xlane.xlu0 %1284 }
 0x391   :  { %v2404_v34 = vpop.eup %2403 }
 0x392   :  { %v1017_v62 = vmul.f32 %v2404_v34, %v2823_v37 }
 0x394   :  { %2031 = vmatmul.mubr.msk.f32.vlgmr.msra.gmra.mrb[4].mxu0 %vm317_vm10, %v745_v44  ;;  %v1282_v22 = vpop.xlane.xlu1 %1281  ;;  %v1429_v44 = vld [vmem:[%s3137_s7 + $0x78] sm:$0xff] }
 0x395   :  { %2217 = vmatpush3.bf16.msk.msra.mxu0 %vm2213_vm15, %v2593_v39  ;;  %2037 = vmatprep.mubr.msk.f32.mxu0 %vm317_vm10, %v879_v51  ;;  %2409 = vrcp.f32 %v1282_v22  ;;  %v2296_v47 = vpack.c.bf16 %v1429_v44, %v1428_v43 }
 0x396   :  { %2220 = vmatprep.subr.msk.bf16.mxu0 %vm2219_vm4, %v2593_v39  ;;  %v2406_v40 = vpop.eup %2405  ;;  %2411 = vrcp.f32 %v1285_v1 }
 0x397   :  { %v1151_v2 = vmul.f32 %v2406_v40, %v2835_v63  ;;  %v2408_v36 = vpop.eup %2407 }
 0x398   :  { %v1153_v3 = vmul.f32 %v2408_v36, %v2829_v46  ;;  %v1405_v46 = vld [vmem:[%s3136_s6 + $0x38] sm:$0xff] }
 0x39c   :  { %2038 = vmatmul.mubr.msk.f32.vlgmr.msra.gmra.mrb[4].mxu0 %vm317_vm10, %v881_v56 }
 0x39d   :  { %2223 = vmatpush3.bf16.msk.msra.mxu0 %vm2219_vm4, %v2593_v39  ;;  %2044 = vmatprep.mubr.msk.f32.mxu0 %vm317_vm10, %v1015_v21 }
 0x39e   :  { %2226 = vmatprep.subr.msk.bf16.mxu0 %vm2225_vm7, %v2593_v39 }
 0x39f   :  { %v2410_v37 = vpop.eup %2409 }
 0x3a0   :  { %v1287_v63 = vmul.f32 %v2410_v37, %v2847_v45  ;;  %v2412_v5 = vpop.eup %2411  ;;  %v2248_v45 = vpack.c.bf16 %v1405_v46, %v1404_v11 }
 0x3a1   :  { %v1289_v6 = vmul.f32 %v2412_v5, %v2841_v10  ;;  %v1407_v10 = vld [vmem:[%s3136_s6 + $0x48] sm:$0xff] }
 0x3a2   :  { %2249 = vmatprep.subr.bf16.mxu1 %v2248_v45 }
 0x3a3   :  { %2251 = vmatpush3.bf16.msra.mxu1 %v2248_v45 }
 0x3a4   :  { %2045 = vmatmul.mubr.msk.f32.vlgmr.msra.gmra.mrb[4].mxu0 %vm317_vm10, %v1017_v62 }
 0x3a5   :  { %2229 = vmatpush3.bf16.msk.msra.mxu0 %vm2225_vm7, %v2593_v39  ;;  %2051 = vmatprep.mubr.msk.f32.mxu0 %vm317_vm10, %v1151_v2 }
 0x3a6   :  { %2232 = vmatprep.subr.msk.bf16.mxu0 %vm2231_vm12, %v2593_v39 }
 0x3ac   :  { %2052 = vmatmul.mubr.msk.f32.vlgmr.msra.gmra.mrb[4].mxu0 %vm317_vm10, %v1153_v3  ;;  %v1430_v3 = vld [vmem:[%s3138_s8] sm:$0x1] }
 0x3ad   :  { %2235 = vmatpush3.bf16.msk.msra.mxu0 %vm2231_vm12, %v2593_v39  ;;  %2058 = vmatprep.mubr.msk.f32.mxu0 %vm317_vm10, %v1287_v63  ;;  %v1406_v39 = vld [vmem:[%s3136_s6 + $0x40] sm:$0xff] }
 0x3ae   :  { %v2252_v12 = vpack.c.bf16 %v1407_v10, %v1406_v39  ;;  %2269 = vmatprep.subr.bf16.mxu0 %v2268_v58 }
 0x3b0   :  { %2253 = vmatprep.subr.bf16.mxu1 %v2252_v12 }
 0x3b1   :  { %2255 = vmatpush3.bf16.msra.mxu1 %v2252_v12 }
 0x3b2   :  { %2257 = vmatprep.subr.bf16.mxu1 %v2256_v15 }
 0x3b4   :  { %2059 = vmatmul.mubr.msk.f32.vlgmr.msra.gmra.mrb[4].mxu0 %vm317_vm10, %v1289_v6 }
 0x3b5   :  { %2259 = vmatpush3.bf16.msra.mxu1 %v2256_v15  ;;  %2271 = vmatpush3.bf16.msra.mxu0 %v2268_v58 }
 0x3b6   :  { %2261 = vmatprep.subr.bf16.mxu1 %v2260_v17  ;;  %2273 = vmatprep.subr.bf16.mxu0 %v2272_v41 }
 0x3b9   :  { %2263 = vmatpush3.bf16.msra.mxu1 %v2260_v17  ;;  %2275 = vmatpush3.bf16.msra.mxu0 %v2272_v41 }
 0x3ba   :  { %2265 = vmatprep.subr.bf16.mxu1 %v2264_v42 }
 0x3bd   :  { %2267 = vmatpush3.bf16.msra.mxu1 %v2264_v42 }
 0x3be   :  { %2300 = vmatprep.subr.bf16.mxu1 %v2449_v32  ;;  %v1418_v32 = vld [vmem:[%s3137_s7 + $0x20] sm:$0xff] }
 0x3bf   :  { %v2276_v23 = vpack.c.bf16 %v1419_v50, %v1418_v32 }
 0x3c1   :  { %2277 = vmatprep.subr.bf16.mxu0 %v2276_v23 }
 0x3c2   :  { %2279 = vmatpush3.bf16.msra.mxu0 %v2276_v23 }
 0x3c3   :  { %2281 = vmatprep.subr.bf16.mxu0 %v2280_v29 }
 0x3c6   :  { %2283 = vmatpush3.bf16.msra.mxu0 %v2280_v29 }
 0x3c7   :  { %2285 = vmatprep.subr.bf16.mxu0 %v2284_v30 }
 0x3ca   :  { %2287 = vmatpush3.bf16.msra.mxu0 %v2284_v30 }
 0x3cb   :  { %2289 = vmatprep.subr.bf16.mxu0 %v2288_v54 }
 0x3ce   :  { %2291 = vmatpush3.bf16.msra.mxu0 %v2288_v54 }
 0x3cf   :  { %2293 = vmatprep.subr.bf16.mxu0 %v2292_v9 }
 0x3d2   :  { %2295 = vmatpush3.bf16.msra.mxu0 %v2292_v9 }
 0x3d3   :  { %2297 = vmatprep.subr.bf16.mxu0 %v2296_v47 }
 0x3d6   :  { %2299 = vmatpush3.bf16.msra.mxu0 %v2296_v47 }
 0x487   :  { %v2060_v51 = vpop.f32.mrb[4].mxu0 }
 0x488   :  { %v1387_v18 = vadd.f32 %v2060_v51, %v1844_v48  ;;  %v1369_v24 = vpop.f32.mrb[5].mxu0 }
 0x489   :  { %v1386_v0 = vadd.f32 %v1844_v48, %v1369_v24 }
 0x48a   :  { %v1392_v56 = vmul.f32 1.442695, %v1387_v18  ;;  %vm1389_vm15 = vcmp.gt.f32.partialorder %v1387_v18, 0.0 }
 0x48b   :  { %v1390_v60 = vmul.f32 1.442695, %v1386_v0  ;;  %vm1388_vm14 = vcmp.gt.f32.partialorder %v1386_v0, 0.0 }
 0x48c   :  { %2413 = vpow2.f32 %v1392_v56 }
 0x48d   :  { %2415 = vpow2.f32 %v1390_v60 }
 0x496   :  { %v2414_v22 = vpop.eup %2413 }
 0x497   :  { %v2416_v21 = vpop.eup %2415  ;;  %v1846_v34 = vadd.f32 -1.0, %v2414_v22 }
 0x498   :  { %v1845_v40 = vadd.f32 -1.0, %v2416_v21 }
 0x499   :  { %v1397_v1 = vsel %vm1389_vm15, %v1387_v18, %v1846_v34 }
 0x49a   :  { %v1396_v62 = vsel %vm1388_vm14, %v1386_v0, %v1845_v40 }
 0x49b   :  { %2093 = vmatprep.mubr.f32.mxu1 %v1396_v62 }
 0x49c   :  { %2094 = vmatmul.mubr.f32.vlgmr.msra.gmra.mrb[2].mxu1 %v1397_v1 }
 0x49d   :  { %2135 = vmatprep.mubr.msk.f32.mxu1 %vm2450_vm1, %v2451_v33 }
 0x56f   :  { %v2095_v2 = vpop.f32.mrb[2].mxu1 }
 0x570   :  { %v1498_v36 = vpop.f32.mrb[3].mxu1 }
 0x571   :  { %v2301_v37 = vpack.c.bf16 %v2095_v2, %v1498_v36  ;;  %2128 = vmatprep.mubr.f32.mxu0 %v1498_v36 }
 0x572   :  { %2129 = vmatmul.mubr.f32.vlgmr.msra.gmra.mrb[6].mxu0 %v2095_v2 }
 0x573   :  { %2302 = vmatpush3.bf16.xpose.msra.mxu1 %v2301_v37 }
 0x574   :  { %2304 = vmatprep.subr.bf16.mxu1 %v2301_v37 }
 0x57a   :  { %2136 = vmatmul.mubr.f32.vlgmr.msra.gmra.mrb[4].mxu1 %v1430_v3 }
 0x57b   :  { %2306 = vmatpush3.bf16.msra.mxu1 %v2301_v37 }
 0x645   :  { %v2130_v63 = vpop.f32.mrb[6].mxu0 }
 0x646   :  { %1659 = vperm.xlu0 %2348, %v2130_v63   ;;  %v1573_v5 = vpop.f32.mrb[7].mxu0 }
 0x647   :  { %1654 = vperm.xlu1 %2347, %v1573_v5  }
 0x64d   :  { %v1648_v6 = vpop.f32.mrb[4].mxu1 }
 0x64e   :  { %v2137_v11 = vpop.f32.mrb[5].mxu1  ;;  %v1665_v33 = vrot.slane %v1648_v6, %v303_v55 }
 0x6c5   :  { %v1660_v46 = vpop.permute.xlu0 %1659 }
 0x6c6   :  { %v1667_v45 = vadd.f32 %v1665_v33, %v1660_v46  ;;  %v1655_v39 = vpop.permute.xlu1 %1654 }
 0x6c7   :  { %v1666_v10 = vadd.f32 %v1665_v33, %v1655_v39 }
 0x6c8   :  { %v1671_v12 = vmul.f32 0.2, %v1667_v45  ;;  %vm1669_vm1 = vcmp.gt.f32.partialorder %v1667_v45, 0.0 }
 0x6c9   :  { %v1670_v35 = vmul.f32 0.2, %v1666_v10  ;;  %vm1668_vm0 = vcmp.gt.f32.partialorder %v1666_v10, 0.0 }
 0x6ca   :  { %v1673_v13 = vsel %vm1669_vm1, %v1667_v45, %v1671_v12 }
 0x6cb   :  { %v1675_v14 = vsel %vm314_vm8, %v1673_v13, -1e+30  ;;  %v1672_v15 = vsel %vm1668_vm0, %v1666_v10, %v1670_v35 }
 0x6cc   :  { %v1679_v16 = vsel %vm317_vm10, %v1675_v14, -inf  ;;  %v1674_v17 = vsel %vm313_vm13, %v1672_v15, -1e+30 }
 0x6cd   :  { %1680 = vmax.xlane.f32.xlu0 %v1679_v16  ;;  %v1676_v53 = vsel %vm317_vm10, %v1674_v17, -inf }
 0x6ce   :  { %1677 = vmax.xlane.f32.xlu1 %v1676_v53 }
 0x75a   :  { %v1681_v55 = vpop.xlane.xlu0 %1680 }
 0x75b   :  { %v1683_v7 = vsub.f32 %v1675_v14, %v1681_v55  ;;  %v1678_v20 = vpop.xlane.xlu1 %1677 }
 0x75c   :  { %v1682_v42 = vsub.f32 %v1674_v17, %v1678_v20 }
 0x75d   :  { %v1686_v49 = vmul.f32 1.442695, %v1683_v7 }
 0x75e   :  { %v1684_v19 = vmul.f32 1.442695, %v1682_v42 }
 0x75f   :  { %2417 = vpow2.f32 %v1686_v49 }
 0x760   :  { %2419 = vpow2.f32 %v1684_v19 }
 0x769   :  { %v2418_v25 = vpop.eup %2417 }
 0x76a   :  { %v2420_v58 = vpop.eup %2419  ;;  %v1689_v32 = vsel %vm314_vm8, %v2418_v25, 0.0 }
 0x76b   :  { %v1688_v26 = vsel %vm313_vm13, %v2420_v58, 0.0  ;;  %v1693_v50 = vsel %vm317_vm10, %v1689_v32, 0.0 }
 0x76c   :  { %v1690_v41 = vsel %vm317_vm10, %v1688_v26, 0.0 }
 0x76d   :  { %1691 = vadd.xlane.f32.xlu1 %v1690_v41 }
 0x771   :  { %1694 = vadd.xlane.f32.xlu1 %v1693_v50 }
 0x7fa   :  { %v1692_v23 = vpop.xlane.xlu1 %1691 }
 0x7fb   :  { %2421 = vrcp.f32 %v1692_v23 }
 0x7fe   :  { %v1695_v27 = vpop.xlane.xlu1 %1694 }
 0x7ff   :  { %2423 = vrcp.f32 %v1695_v27 }
 0x805   :  { %v2422_v28 = vpop.eup %2421 }
 0x806   :  { %v1697_v29 = vmul.f32 %v2422_v28, %v1688_v26 }
 0x808   :  { %2142 = vmatprep.mubr.msk.f32.mxu1 %vm317_vm10, %v1697_v29 }
 0x809   :  { %v2424_v52 = vpop.eup %2423 }
 0x80a   :  { %v1699_v8 = vmul.f32 %v2424_v52, %v1689_v32 }
 0x80c   :  { %2143 = vmatmul.mubr.msk.f32.vlgmr.msra.gmra.mrb[6].mxu1 %vm317_vm10, %v1699_v8 }
 0x8df   :  { %v2144_v61 = vpop.f32.mrb[6].mxu1 }
 0x8e0   :  { %v1789_v30 = vadd.f32 %v2144_v61, %v1847_v59  ;;  %v1783_v31 = vpop.f32.mrb[7].mxu1 }
 0x8e1   :  { %v1784_v57 = vadd.f32 %v1847_v59, %v1783_v31 }
 0x8e2   :  { %1793 = vst [vmem:[#allocation2 + $0x8] sm:$0xff] %v1789_v30 }
 0x8e3   :  { %1792 = vst [vmem:[#allocation2] sm:$0xff] %v1784_v57 }
 0x8e4   :  { %2436 = shalt.err (!%p2433_p4)
}
 0x8e5   :  { %s2437_s9 = scalar_lea.hbm %s3140_s10, 256 }
 0x8e6   :  { %p2438_p5 = scmp.ne.s32.totalorder %s3140_s10, %s2437_s9  ;;  %p2441_p6 = scmp.lt.u32.totalorder %s2437_s9, %s3140_s10 }
 0x8e8   :  { %p2443_p7 = pnand %p2441_p6, %p2438_p5 }
 0x8ea   :  { %2446 = shalt.err (!%p2443_p7)
}
 0x8eb   :  { %s2461_s17 = smov 128   ;;  %s2462_s1 = smov 8  }
 0x8ec   :  { %1805 = dma.vmem_to_hbm [thread:$0]  %s1800_s11, 256, %s3140_s10, [#allocation3], %s2461_s17, %s2461_s17, %s2462_s1  }
 0x8ed   :  { %2447 = dma.done.wait [#allocation3], 256  }
 0x8ee   :  { %2448 = vsyncadd [#allocation3], 4294967040 }
 0x8ef   :  { %1809 = vsyncpa [#allocation3], 1 }

</bundles_post_ra>
